<compile_context>
chip_gen: v7x
topology: tpu7x:2x2x1
jax: 0.10.0
libtpu: 0.0.40
codegen_flags: <defaults>
</compile_context>

<pallas_src>
import itertools
import numpy as np

import jax
import jax.numpy as jnp
from jax import lax
from jax.experimental import pallas as pl
from jax.experimental.pallas import tpu as pltpu


# ----------------------------------------------------------------------------
# Kernel
# ----------------------------------------------------------------------------
def make_graphnet_kernel(cfg):
    N, Nv, P, S = cfg["N"], cfg["Nv"], cfg["P"], cfg["S"]
    H, H2, De, Do, T, TB = (cfg["H"], cfg["H2"], cfg["De"], cfg["Do"],
                            cfg["T"], cfg["TB"])
    boff = cfg["boff"]          # static row offsets into the bias slab
    w3off = cfg["w3off"]        # static row offsets into the layer-3 slab
    TBN = TB * N

    f32, bf16 = jnp.float32, jnp.bfloat16

    def dot(a, b):
        # bf16 inputs, f32 accumulation -> single-pass MXU.
        return jnp.dot(a.astype(bf16), b.astype(bf16),
                       preferred_element_type=f32)

    def relu(v):
        return jnp.maximum(v, 0.0)

    def kernel(x_ref, y_ref, w1_ref, w1pb_ref, w2_ref, w3_ref, wo1bc_ref,
               wc_ref, b_ref, f_ref, n_ref):
        X = x_ref[0]                                   # [P, TB*N]   bf16
        Y = y_ref[0]                                   # [S, TB*Nv]  bf16

        # iota-built 0/1 helper matrices (no HBM relation matrices, no DMA).
        col_t = lax.broadcasted_iota(jnp.int32, (TB, TBN), 1)
        row_t = lax.broadcasted_iota(jnp.int32, (TB, TBN), 0)
        tile_mat = jnp.where((col_t & (TB - 1)) == row_t, 1.0, 0.0).astype(bf16)
        row_p = lax.broadcasted_iota(jnp.int32, (TBN, TB), 0)
        col_p = lax.broadcasted_iota(jnp.int32, (TBN, TB), 1)
        pool_mat = jnp.where((row_p & (TB - 1)) == col_p, 1.0, 0.0).astype(bf16)
        lane_id = lax.broadcasted_iota(jnp.int32, (De, TBN), 1)

        # biases (kept f32, broadcast along the lane axis).
        def bias(name, rows):
            o = boff[name]
            return b_ref[o:o + rows, :]
        b1, b1p, bo1 = bias("b1", H), bias("b1p", H), bias("bo1", H)
        b2, b2p, bo2 = bias("b2", H2), bias("b2p", H2), bias("bo2", H2)
        b3, b3p = bias("b3", De), bias("b3p", De)
        bo3, bc = bias("bo3", Do), bias("bc", T)

        # layer-2 / layer-3 weight slices (static, sublane-aligned offsets).
        w2_pp = w2_ref[0:H2, :]
        w2_pv = w2_ref[H2:2 * H2, :]
        w2_o = w2_ref[2 * H2:3 * H2, :]
        w3_pp = w3_ref[w3off[0]:w3off[0] + De, :]
        w3_pv = w3_ref[w3off[1]:w3off[1] + De, :]
        w3_o = w3_ref[w3off[2]:w3off[2] + Do, :]

        # Fused layer-1 matmuls over the *unique* constituents: one MXU pass
        # yields W1a@x, W1b@x, W1pa@x and Wo1a@x for all TB*N lanes.
        t_all = dot(w1_ref[...], X)                    # [4H, TB*N] f32
        t_r = t_all[0 * H:1 * H, :]                    # receiver term   (pp)
        t_s = t_all[1 * H:2 * H, :]                    # sender term     (pp)
        t_k = t_all[2 * H:3 * H, :]                    # constituent term (pv)
        o_x = t_all[3 * H:4 * H, :]                    # Wo1a @ x (object MLP)
        t_v = dot(w1pb_ref[...], Y)                    # [H, TB*Nv] vertex term

        # ---- particle-particle edges ------------------------------------
        # Loop over sender constituent s: every lane (receiver r, batch b)
        # gets sender s's features via the tiny tile_mat lane-broadcast.
        # Lanes with r == s (no self edge) are masked out of the aggregation.
        ebar_pp = jnp.zeros((De, TBN), f32)
        for s in range(N):
            snd = dot(t_s[:, s * TB:(s + 1) * TB], tile_mat)      # [H, TBN]
            z = relu(t_r + snd + b1)
            z = relu(dot(w2_pp, z) + b2)
            e = relu(dot(w3_pp, z) + b3)                          # [De, TBN]
            keep = jnp.logical_or(lane_id < s * TB, lane_id >= (s + 1) * TB)
            ebar_pp = ebar_pp + jnp.where(keep, e, 0.0)

        # ---- particle-vertex edges ----------------------------------------
        # (Ebar_vp is unused in the PyTorch forward when vv_branch=False.)
        ebar_pv = jnp.zeros((De, TBN), f32)
        for v in range(Nv):
            vtx = dot(t_v[:, v * TB:(v + 1) * TB], tile_mat)      # [H, TBN]
            z = relu(t_k + vtx + b1p)
            z = relu(dot(w2_pv, z) + b2p)
            e = relu(dot(w3_pv, z) + b3p)                         # [De, TBN]
            ebar_pv = ebar_pv + e

        # ---- object MLP + sum-pool + final fc ------------------------------
        wo1b = wo1bc_ref[0:H, :]
        wo1c = wo1bc_ref[H:2 * H, :]
        z = relu(o_x + dot(wo1b, ebar_pp) + dot(wo1c, ebar_pv) + bo1)
        z = relu(dot(w2_o, z) + bo2)
        o = relu(dot(w3_o, z) + bo3)                              # [Do, TBN]

        nagg = dot(o, pool_mat)                                   # [Do, TB]
        f = dot(wc_ref[...], nagg) + bc                           # [T,  TB]

        n_ref[0] = nagg
        f_ref[0] = f

    return kernel


# ----------------------------------------------------------------------------
# Wrapper
# ----------------------------------------------------------------------------
def graphnet_adv_forward(x, y, params, dims, tb=4):
    N, Nv, P, S, H, De, Do, T = dims
    H2 = H // 2
    assert tb > 0 and (tb & (tb - 1)) == 0, "tb must be a power of two"

    B = x.shape[0]
    G = -(-B // tb)
    Bp = G * tb
    if Bp != B:
        pad = Bp - B
        x = jnp.pad(x, ((0, pad), (0, 0), (0, 0)))
        y = jnp.pad(y, ((0, pad), (0, 0), (0, 0)))

    bf16 = jnp.bfloat16
    # Batch-stacked, lane-dense layouts: lane = entity * tb + batch_in_tile.
    xs = x.reshape(G, tb, P, N).transpose(0, 2, 3, 1).reshape(G, P, N * tb)
    ys = y.reshape(G, tb, S, Nv).transpose(0, 2, 3, 1).reshape(G, S, Nv * tb)
    xs = xs.astype(bf16)
    ys = ys.astype(bf16)

    # ---- pack the 10 Linear layers into a few slabs (fewer, larger DMAs) ---
    w1a = params["fr1_w"][:, :P]
    w1b = params["fr1_w"][:, P:]
    w1pa = params["fr1_pv_w"][:, :P]
    w1pb = params["fr1_pv_w"][:, P:]
    wo1a = params["fo1_w"][:, :P]
    wo1b = params["fo1_w"][:, P:P + De]
    wo1c = params["fo1_w"][:, P + De:]

    w1_slab = jnp.concatenate([w1a, w1b, w1pa, wo1a], axis=0).astype(bf16)
    w2_slab = jnp.concatenate(
        [params["fr2_w"], params["fr2_pv_w"], params["fo2_w"]],
        axis=0).astype(bf16)

    rup8 = lambda n: -(-n // 8) * 8
    pad8 = lambda w: jnp.pad(w, ((0, rup8(w.shape[0]) - w.shape[0]), (0, 0)))
    w3_slab = jnp.concatenate(
        [pad8(params["fr3_w"]), pad8(params["fr3_pv_w"]), pad8(params["fo3_w"])],
        axis=0).astype(bf16)
    w3off = (0, rup8(De), rup8(De) + rup8(De))

    wo1bc = jnp.concatenate([wo1b, wo1c], axis=0).astype(bf16)
    wc = params["fc_fixed_w"].astype(bf16)

    bias_order = [("b1", "fr1_b"), ("b1p", "fr1_pv_b"), ("bo1", "fo1_b"),
                  ("b2", "fr2_b"), ("b2p", "fr2_pv_b"), ("bo2", "fo2_b"),
                  ("b3", "fr3_b"), ("b3p", "fr3_pv_b"), ("bo3", "fo3_b"),
                  ("bc", "fc_fixed_b")]
    boff, chunks, r = {}, [], 0
    for short, pname in bias_order:
        v = params[pname][:, None]
        boff[short] = r
        chunks.append(pad8(v))
        r += rup8(v.shape[0])
    b_slab = jnp.concatenate(chunks, axis=0).astype(jnp.float32)

    cfg = dict(N=N, Nv=Nv, P=P, S=S, H=H, H2=H2, De=De, Do=Do, T=T, TB=tb,
               boff=boff, w3off=w3off)
    kernel = make_graphnet_kernel(cfg)

    weight_ops = (w1_slab, w1pb.astype(bf16), w2_slab, w3_slab, wo1bc, wc,
                  b_slab)

    const_spec = lambda a: pl.BlockSpec(a.shape, lambda g: (0,) * a.ndim)
    in_specs = [
        pl.BlockSpec((1, P, N * tb), lambda g: (g, 0, 0)),
        pl.BlockSpec((1, S, Nv * tb), lambda g: (g, 0, 0)),
    ] + [const_spec(a) for a in weight_ops]

    out_shape = (jax.ShapeDtypeStruct((G, T, tb), jnp.float32),
                 jax.ShapeDtypeStruct((G, Do, tb), jnp.float32))
    out_specs = (pl.BlockSpec((1, T, tb), lambda g: (g, 0, 0)),
                 pl.BlockSpec((1, Do, tb), lambda g: (g, 0, 0)))

    Nr, Nt = N * (N - 1), N * Nv
    flops = 2 * Bp * (Nr * (2 * P * H + H * H2 + H2 * De)
                      + Nt * ((P + S) * H + H * H2 + H2 * De)
                      + N * ((P + 2 * De) * H + H * H2 + H2 * Do)
                      + Do * T)
    bytes_accessed = int(
        xs.size * 2 + ys.size * 2
        + sum(int(a.size) * a.dtype.itemsize for a in weight_ops)
        + (G * T * tb + G * Do * tb) * 4)

    f, n = pl.pallas_call(
        kernel,
        grid=(G,),
        in_specs=in_specs,
        out_specs=out_specs,
        out_shape=out_shape,
        compiler_params=pltpu.CompilerParams(
            dimension_semantics=("parallel",)),
        cost_estimate=pl.CostEstimate(
            flops=flops, transcendentals=0, bytes_accessed=bytes_accessed),
    )(xs, ys, *weight_ops)

    F = f.transpose(0, 2, 1).reshape(Bp, T)[:B]
    Nagg = n.transpose(0, 2, 1).reshape(Bp, Do)[:B]
    return F, Nagg


# ----------------------------------------------------------------------------
# Parameter init + pure-JAX reference (f32) for correctness checking
# ----------------------------------------------------------------------------
def make_relation_matrices(N, Nv):
    Nr, Nt = N * (N - 1), N * Nv
    Rr = np.zeros((N, Nr), np.float32)
    Rs = np.zeros((N, Nr), np.float32)
    for i, (r, s) in enumerate(p for p in itertools.product(range(N), range(N))
                               if p[0] != p[1]):
        Rr[r, i] = 1.0
        Rs[s, i] = 1.0
    Rk = np.zeros((N, Nt), np.float32)
    Rv = np.zeros((Nv, Nt), np.float32)
    for i, (k, v) in enumerate(itertools.product(range(N), range(Nv))):
        Rk[k, i] = 1.0
        Rv[v, i] = 1.0
    return (jnp.asarray(Rr), jnp.asarray(Rs), jnp.asarray(Rk), jnp.asarray(Rv))


def init_linear(key, out_dim, in_dim):
    # PyTorch nn.Linear default init: U(-1/sqrt(in), 1/sqrt(in)) for W and b.
    kw, kb = jax.random.split(key)
    bound = 1.0 / np.sqrt(in_dim)
    w = jax.random.uniform(kw, (out_dim, in_dim), jnp.float32, -bound, bound)
    b = jax.random.uniform(kb, (out_dim,), jnp.float32, -bound, bound)
    return w, b


def init_params(key, P, S, hidden, De, Do, n_targets):
    H, H2 = hidden, hidden // 2
    names_dims = [
        ("fr1", H, 2 * P), ("fr2", H2, H), ("fr3", De, H2),
        ("fr1_pv", H, S + P), ("fr2_pv", H2, H), ("fr3_pv", De, H2),
        ("fo1", H, P + 2 * De), ("fo2", H2, H), ("fo3", Do, H2),
        ("fc_fixed", n_targets, Do),
    ]
    keys = jax.random.split(key, len(names_dims))
    params = {}
    for k, (name, o, i) in zip(keys, names_dims):
        w, b = init_linear(k, o, i)
        params[name + "_w"] = w
        params[name + "_b"] = b
    return params


def reference_forward(x, y, params, R, dims):
    """Pure-JAX f32 transcription of the PyTorch forward (vv_branch=False)."""
    N, Nv, P, S, H, De, Do, T = dims
    Rr, Rs, Rk, Rv = R
    PREC = lax.Precision.HIGHEST
    lin = lambda z, w, b: jnp.einsum("...i,oi->...o", z, w, precision=PREC) + b
    relu = jax.nn.relu

    Orr = jnp.einsum("bpn,nr->bpr", x, Rr, precision=PREC)
    Ors = jnp.einsum("bpn,nr->bpr", x, Rs, precision=PREC)
    Bc = jnp.transpose(jnp.concatenate([Orr, Ors], axis=1), (0, 2, 1))
    h = relu(lin(Bc, params["fr1_w"], params["fr1_b"]))
    h = relu(lin(h, params["fr2_w"], params["fr2_b"]))
    E = relu(lin(h, params["fr3_w"], params["fr3_b"]))
    Ebar_pp = jnp.einsum("brd,nr->bdn", E, Rr, precision=PREC)

    Ork = jnp.einsum("bpn,nt->bpt", x, Rk, precision=PREC)
    Orv = jnp.einsum("bsv,vt->bst", y, Rv, precision=PREC)
    Bc = jnp.transpose(jnp.concatenate([Ork, Orv], axis=1), (0, 2, 1))
    h = relu(lin(Bc, params["fr1_pv_w"], params["fr1_pv_b"]))
    h = relu(lin(h, params["fr2_pv_w"], params["fr2_pv_b"]))
    E = relu(lin(h, params["fr3_pv_w"], params["fr3_pv_b"]))
    Ebar_pv = jnp.einsum("btd,nt->bdn", E, Rk, precision=PREC)

    C = jnp.transpose(jnp.concatenate([x, Ebar_pp, Ebar_pv], axis=1), (0, 2, 1))
    h = relu(lin(C, params["fo1_w"], params["fo1_b"]))
    h = relu(lin(h, params["fo2_w"], params["fo2_b"]))
    O = relu(lin(h, params["fo3_w"], params["fo3_b"]))
    Nagg = jnp.sum(O, axis=1)
    F = lin(Nagg, params["fc_fixed_w"], params["fc_fixed_b"])
    return F, Nagg


# ----------------------------------------------------------------------------
if __name__ == "__main__":
    # Small, forward-consistent sizes.
    B, N, Nv, P, S = 8, 8, 4, 4, 4
    hidden, De, Do, n_targets = 32, 5, 6, 3
    dims = (N, Nv, P, S, hidden, De, Do, n_targets)

    key = jax.random.PRNGKey(0)
    kx, ky, kp = jax.random.split(key, 3)
    x = jax.random.normal(kx, (B, P, N), jnp.float32)
    y = jax.random.normal(ky, (B, S, Nv), jnp.float32)

    params = init_params(kp, P, S, hidden, De, Do, n_targets)

    fwd = jax.jit(lambda x, y: graphnet_adv_forward(x, y, params, dims, tb=4))
    F, Nagg = fwd(x, y)
    jax.block_until_ready((F, Nagg))

    R = make_relation_matrices(N, Nv)
    F_ref, N_ref = reference_forward(x, y, params, R, dims)

    assert F.shape == (B, n_targets) and Nagg.shape == (B, Do)
    # bf16 matmuls with f32 accumulation -> loosened tolerance vs. f32 reference
    assert jnp.allclose(F, F_ref, rtol=5e-2, atol=5e-2), \
        float(jnp.max(jnp.abs(F - F_ref)))
    assert jnp.allclose(Nagg, N_ref, rtol=5e-2, atol=5e-2), \
        float(jnp.max(jnp.abs(Nagg - N_ref)))

    print("KERNEL_OK")
</pallas_src>

<mosaic_0001>
module attributes {stable_mosaic.version = 11 : i64} {
  func.func @kernel(%arg0: i32, %arg1: memref<1x4x32xbf16, #tpu.memory_space<vmem>>, %arg2: memref<1x4x16xbf16, #tpu.memory_space<vmem>>, %arg3: memref<128x4xbf16, #tpu.memory_space<vmem>>, %arg4: memref<32x4xbf16, #tpu.memory_space<vmem>>, %arg5: memref<48x32xbf16, #tpu.memory_space<vmem>>, %arg6: memref<24x16xbf16, #tpu.memory_space<vmem>>, %arg7: memref<64x5xbf16, #tpu.memory_space<vmem>>, %arg8: memref<3x6xbf16, #tpu.memory_space<vmem>>, %arg9: memref<176x1xf32, #tpu.memory_space<vmem>>, %arg10: memref<1x3x4xf32, #tpu.memory_space<vmem>>, %arg11: memref<1x6x4xf32, #tpu.memory_space<vmem>>) attributes {dimension_semantics = [#tpu.dimension_semantics<parallel>], iteration_bounds = array<i64: 2>, scalar_prefetch = 0 : i64, scratch_operands = 0 : i64, tpu.core_type = #tpu.core_type<tc>, window_params = [{transform_indices = @transform_0, window_bounds = array<i64: 1, 4, 32>}, {transform_indices = @transform_1, window_bounds = array<i64: 1, 4, 16>}, {pipeline_mode = #tpu.pipeline_mode<synchronous>, transform_indices = @transform_2, window_bounds = array<i64: 128, 4>}, {pipeline_mode = #tpu.pipeline_mode<synchronous>, transform_indices = @transform_3, window_bounds = array<i64: 32, 4>}, {pipeline_mode = #tpu.pipeline_mode<synchronous>, transform_indices = @transform_4, window_bounds = array<i64: 48, 32>}, {pipeline_mode = #tpu.pipeline_mode<synchronous>, transform_indices = @transform_5, window_bounds = array<i64: 24, 16>}, {pipeline_mode = #tpu.pipeline_mode<synchronous>, transform_indices = @transform_6, window_bounds = array<i64: 64, 5>}, {pipeline_mode = #tpu.pipeline_mode<synchronous>, transform_indices = @transform_7, window_bounds = array<i64: 3, 6>}, {pipeline_mode = #tpu.pipeline_mode<synchronous>, transform_indices = @transform_8, window_bounds = array<i64: 176, 1>}, {transform_indices = @transform_9, window_bounds = array<i64: 1, 3, 4>}, {transform_indices = @transform_10, window_bounds = array<i64: 1, 6, 4>}]} {
    %c0 = arith.constant 0 : index
    %c0_0 = arith.constant 0 : index
    %c0_1 = arith.constant 0 : index
    %0 = vector.load %arg1[%c0, %c0_0, %c0_1] : memref<1x4x32xbf16, #tpu.memory_space<vmem>>, vector<1x4x32xbf16>
    %1 = vector.shape_cast %0 : vector<1x4x32xbf16> to vector<4x32xbf16>
    %c0_2 = arith.constant 0 : index
    %c0_3 = arith.constant 0 : index
    %c0_4 = arith.constant 0 : index
    %2 = vector.load %arg2[%c0_2, %c0_3, %c0_4] : memref<1x4x16xbf16, #tpu.memory_space<vmem>>, vector<1x4x16xbf16>
    %3 = vector.shape_cast %2 : vector<1x4x16xbf16> to vector<4x16xbf16>
    %4 = tpu.iota {dimensions = array<i32: 1>} : vector<4x32xi32>
    %5 = tpu.iota {dimensions = array<i32: 0>} : vector<4x32xi32>
    %c3_i32 = arith.constant 3 : i32
    %6 = vector.broadcast %c3_i32 : i32 to vector<4x32xi32>
    %7 = arith.andi %4, %6 : vector<4x32xi32>
    %8 = arith.cmpi eq, %7, %5 : vector<4x32xi32>
    %cst = arith.constant 1.000000e+00 : f32
    %cst_5 = arith.constant 0.000000e+00 : f32
    %9 = vector.broadcast %cst : f32 to vector<4x32xf32>
    %10 = vector.broadcast %cst_5 : f32 to vector<4x32xf32>
    %11 = arith.select %8, %9, %10 : vector<4x32xi1>, vector<4x32xf32>
    %12 = arith.truncf %11 : vector<4x32xf32> to vector<4x32xbf16>
    %13 = tpu.iota {dimensions = array<i32: 0>} : vector<32x4xi32>
    %14 = tpu.iota {dimensions = array<i32: 1>} : vector<32x4xi32>
    %c3_i32_6 = arith.constant 3 : i32
    %15 = vector.broadcast %c3_i32_6 : i32 to vector<32x4xi32>
    %16 = arith.andi %13, %15 : vector<32x4xi32>
    %17 = arith.cmpi eq, %16, %14 : vector<32x4xi32>
    %cst_7 = arith.constant 1.000000e+00 : f32
    %cst_8 = arith.constant 0.000000e+00 : f32
    %18 = vector.broadcast %cst_7 : f32 to vector<32x4xf32>
    %19 = vector.broadcast %cst_8 : f32 to vector<32x4xf32>
    %20 = arith.select %17, %18, %19 : vector<32x4xi1>, vector<32x4xf32>
    %21 = arith.truncf %20 : vector<32x4xf32> to vector<32x4xbf16>
    %22 = tpu.iota {dimensions = array<i32: 1>} : vector<5x32xi32>
    %c0_9 = arith.constant 0 : index
    %c0_10 = arith.constant 0 : index
    %23 = vector.load %arg9[%c0_9, %c0_10] : memref<176x1xf32, #tpu.memory_space<vmem>>, vector<32x1xf32>
    %c32 = arith.constant 32 : index
    %c0_11 = arith.constant 0 : index
    %24 = vector.load %arg9[%c32, %c0_11] : memref<176x1xf32, #tpu.memory_space<vmem>>, vector<32x1xf32>
    %c64 = arith.constant 64 : index
    %c0_12 = arith.constant 0 : index
    %25 = vector.load %arg9[%c64, %c0_12] : memref<176x1xf32, #tpu.memory_space<vmem>>, vector<32x1xf32>
    %c96 = arith.constant 96 : index
    %c0_13 = arith.constant 0 : index
    %26 = vector.load %arg9[%c96, %c0_13] : memref<176x1xf32, #tpu.memory_space<vmem>>, vector<16x1xf32>
    %c112 = arith.constant 112 : index
    %c0_14 = arith.constant 0 : index
    %27 = vector.load %arg9[%c112, %c0_14] : memref<176x1xf32, #tpu.memory_space<vmem>>, vector<16x1xf32>
    %c128 = arith.constant 128 : index
    %c0_15 = arith.constant 0 : index
    %28 = vector.load %arg9[%c128, %c0_15] : memref<176x1xf32, #tpu.memory_space<vmem>>, vector<16x1xf32>
    %c144 = arith.constant 144 : index
    %c0_16 = arith.constant 0 : index
    %29 = vector.load %arg9[%c144, %c0_16] : memref<176x1xf32, #tpu.memory_space<vmem>>, vector<5x1xf32>
    %c152 = arith.constant 152 : index
    %c0_17 = arith.constant 0 : index
    %30 = vector.load %arg9[%c152, %c0_17] : memref<176x1xf32, #tpu.memory_space<vmem>>, vector<5x1xf32>
    %c160 = arith.constant 160 : index
    %c0_18 = arith.constant 0 : index
    %31 = vector.load %arg9[%c160, %c0_18] : memref<176x1xf32, #tpu.memory_space<vmem>>, vector<6x1xf32>
    %c168 = arith.constant 168 : index
    %c0_19 = arith.constant 0 : index
    %32 = vector.load %arg9[%c168, %c0_19] : memref<176x1xf32, #tpu.memory_space<vmem>>, vector<3x1xf32>
    %c0_20 = arith.constant 0 : index
    %c0_21 = arith.constant 0 : index
    %33 = vector.load %arg5[%c0_20, %c0_21] : memref<48x32xbf16, #tpu.memory_space<vmem>>, vector<16x32xbf16>
    %c16 = arith.constant 16 : index
    %c0_22 = arith.constant 0 : index
    %34 = vector.load %arg5[%c16, %c0_22] : memref<48x32xbf16, #tpu.memory_space<vmem>>, vector<16x32xbf16>
    %c32_23 = arith.constant 32 : index
    %c0_24 = arith.constant 0 : index
    %35 = vector.load %arg5[%c32_23, %c0_24] : memref<48x32xbf16, #tpu.memory_space<vmem>>, vector<16x32xbf16>
    %c0_25 = arith.constant 0 : index
    %c0_26 = arith.constant 0 : index
    %36 = vector.load %arg6[%c0_25, %c0_26] : memref<24x16xbf16, #tpu.memory_space<vmem>>, vector<5x16xbf16>
    %c8 = arith.constant 8 : index
    %c0_27 = arith.constant 0 : index
    %37 = vector.load %arg6[%c8, %c0_27] : memref<24x16xbf16, #tpu.memory_space<vmem>>, vector<5x16xbf16>
    %c16_28 = arith.constant 16 : index
    %c0_29 = arith.constant 0 : index
    %38 = vector.load %arg6[%c16_28, %c0_29] : memref<24x16xbf16, #tpu.memory_space<vmem>>, vector<6x16xbf16>
    %c0_30 = arith.constant 0 : index
    %c0_31 = arith.constant 0 : index
    %39 = vector.load %arg3[%c0_30, %c0_31] : memref<128x4xbf16, #tpu.memory_space<vmem>>, vector<128x4xbf16>
    %cst_32 = arith.constant dense<0.000000e+00> : vector<128x32xf32>
    %40 = tpu.matmul %39, %1, %cst_32 {dimension_numbers = #tpu.dot_dimension_numbers<[1], [0], [0], [1], [0, 0, 1, 1], [], []>} : vector<128x4xbf16>, vector<4x32xbf16>, vector<128x32xf32> -> vector<128x32xf32>
    %41 = vector.extract_strided_slice %40 {offsets = [0, 0], sizes = [32, 32], strides = [1, 1]} : vector<128x32xf32> to vector<32x32xf32>
    %42 = vector.extract_strided_slice %40 {offsets = [32, 0], sizes = [32, 32], strides = [1, 1]} : vector<128x32xf32> to vector<32x32xf32>
    %43 = vector.extract_strided_slice %40 {offsets = [64, 0], sizes = [32, 32], strides = [1, 1]} : vector<128x32xf32> to vector<32x32xf32>
    %44 = vector.extract_strided_slice %40 {offsets = [96, 0], sizes = [32, 32], strides = [1, 1]} : vector<128x32xf32> to vector<32x32xf32>
    %c0_33 = arith.constant 0 : index
    %c0_34 = arith.constant 0 : index
    %45 = vector.load %arg4[%c0_33, %c0_34] : memref<32x4xbf16, #tpu.memory_space<vmem>>, vector<32x4xbf16>
    %cst_35 = arith.constant dense<0.000000e+00> : vector<32x16xf32>
    %46 = tpu.matmul %45, %3, %cst_35 {dimension_numbers = #tpu.dot_dimension_numbers<[1], [0], [0], [1], [0, 0, 1, 1], [], []>} : vector<32x4xbf16>, vector<4x16xbf16>, vector<32x16xf32> -> vector<32x16xf32>
    %cst_36 = arith.constant 0.000000e+00 : f32
    %47 = vector.broadcast %cst_36 : f32 to vector<5x32xf32>
    %48 = vector.extract_strided_slice %42 {offsets = [0, 0], sizes = [32, 4], strides = [1, 1]} : vector<32x32xf32> to vector<32x4xf32>
    %49 = arith.truncf %48 : vector<32x4xf32> to vector<32x4xbf16>
    %cst_37 = arith.constant dense<0.000000e+00> : vector<32x32xf32>
    %50 = tpu.matmul %49, %12, %cst_37 {dimension_numbers = #tpu.dot_dimension_numbers<[1], [0], [0], [1], [0, 0, 1, 1], [], []>} : vector<32x4xbf16>, vector<4x32xbf16>, vector<32x32xf32> -> vector<32x32xf32>
    %51 = arith.addf %41, %50 : vector<32x32xf32>
    %52 = vector.broadcast %23 : vector<32x1xf32> to vector<32x32xf32>
    %53 = arith.addf %51, %52 : vector<32x32xf32>
    %cst_38 = arith.constant 0.000000e+00 : f32
    %54 = vector.broadcast %cst_38 : f32 to vector<32x32xf32>
    %55 = arith.maximumf %53, %54 : vector<32x32xf32>
    %56 = arith.truncf %55 : vector<32x32xf32> to vector<32x32xbf16>
    %cst_39 = arith.constant dense<0.000000e+00> : vector<16x32xf32>
    %57 = tpu.matmul %33, %56, %cst_39 {dimension_numbers = #tpu.dot_dimension_numbers<[1], [0], [0], [1], [0, 0, 1, 1], [], []>} : vector<16x32xbf16>, vector<32x32xbf16>, vector<16x32xf32> -> vector<16x32xf32>
    %58 = vector.broadcast %26 : vector<16x1xf32> to vector<16x32xf32>
    %59 = arith.addf %57, %58 : vector<16x32xf32>
    %cst_40 = arith.constant 0.000000e+00 : f32
    %60 = vector.broadcast %cst_40 : f32 to vector<16x32xf32>
    %61 = arith.maximumf %59, %60 : vector<16x32xf32>
    %62 = arith.truncf %61 : vector<16x32xf32> to vector<16x32xbf16>
    %cst_41 = arith.constant dense<0.000000e+00> : vector<5x32xf32>
    %63 = tpu.matmul %36, %62, %cst_41 {dimension_numbers = #tpu.dot_dimension_numbers<[1], [0], [0], [1], [0, 0, 1, 1], [], []>} : vector<5x16xbf16>, vector<16x32xbf16>, vector<5x32xf32> -> vector<5x32xf32>
    %64 = vector.broadcast %29 : vector<5x1xf32> to vector<5x32xf32>
    %65 = arith.addf %63, %64 : vector<5x32xf32>
    %cst_42 = arith.constant 0.000000e+00 : f32
    %66 = vector.broadcast %cst_42 : f32 to vector<5x32xf32>
    %67 = arith.maximumf %65, %66 : vector<5x32xf32>
    %c0_i32 = arith.constant 0 : i32
    %68 = vector.broadcast %c0_i32 : i32 to vector<5x32xi32>
    %69 = arith.cmpi slt, %22, %68 : vector<5x32xi32>
    %c4_i32 = arith.constant 4 : i32
    %70 = vector.broadcast %c4_i32 : i32 to vector<5x32xi32>
    %71 = arith.cmpi sge, %22, %70 : vector<5x32xi32>
    %72 = arith.ori %69, %71 : vector<5x32xi1>
    %cst_43 = arith.constant 0.000000e+00 : f32
    %73 = vector.broadcast %cst_43 : f32 to vector<5x32xf32>
    %74 = arith.select %72, %67, %73 : vector<5x32xi1>, vector<5x32xf32>
    %75 = arith.addf %47, %74 : vector<5x32xf32>
    %76 = vector.extract_strided_slice %42 {offsets = [0, 4], sizes = [32, 4], strides = [1, 1]} : vector<32x32xf32> to vector<32x4xf32>
    %77 = arith.truncf %76 : vector<32x4xf32> to vector<32x4xbf16>
    %cst_44 = arith.constant dense<0.000000e+00> : vector<32x32xf32>
    %78 = tpu.matmul %77, %12, %cst_44 {dimension_numbers = #tpu.dot_dimension_numbers<[1], [0], [0], [1], [0, 0, 1, 1], [], []>} : vector<32x4xbf16>, vector<4x32xbf16>, vector<32x32xf32> -> vector<32x32xf32>
    %79 = arith.addf %41, %78 : vector<32x32xf32>
    %80 = vector.broadcast %23 : vector<32x1xf32> to vector<32x32xf32>
    %81 = arith.addf %79, %80 : vector<32x32xf32>
    %cst_45 = arith.constant 0.000000e+00 : f32
    %82 = vector.broadcast %cst_45 : f32 to vector<32x32xf32>
    %83 = arith.maximumf %81, %82 : vector<32x32xf32>
    %84 = arith.truncf %83 : vector<32x32xf32> to vector<32x32xbf16>
    %cst_46 = arith.constant dense<0.000000e+00> : vector<16x32xf32>
    %85 = tpu.matmul %33, %84, %cst_46 {dimension_numbers = #tpu.dot_dimension_numbers<[1], [0], [0], [1], [0, 0, 1, 1], [], []>} : vector<16x32xbf16>, vector<32x32xbf16>, vector<16x32xf32> -> vector<16x32xf32>
    %86 = vector.broadcast %26 : vector<16x1xf32> to vector<16x32xf32>
    %87 = arith.addf %85, %86 : vector<16x32xf32>
    %cst_47 = arith.constant 0.000000e+00 : f32
    %88 = vector.broadcast %cst_47 : f32 to vector<16x32xf32>
    %89 = arith.maximumf %87, %88 : vector<16x32xf32>
    %90 = arith.truncf %89 : vector<16x32xf32> to vector<16x32xbf16>
    %cst_48 = arith.constant dense<0.000000e+00> : vector<5x32xf32>
    %91 = tpu.matmul %36, %90, %cst_48 {dimension_numbers = #tpu.dot_dimension_numbers<[1], [0], [0], [1], [0, 0, 1, 1], [], []>} : vector<5x16xbf16>, vector<16x32xbf16>, vector<5x32xf32> -> vector<5x32xf32>
    %92 = vector.broadcast %29 : vector<5x1xf32> to vector<5x32xf32>
    %93 = arith.addf %91, %92 : vector<5x32xf32>
    %cst_49 = arith.constant 0.000000e+00 : f32
    %94 = vector.broadcast %cst_49 : f32 to vector<5x32xf32>
    %95 = arith.maximumf %93, %94 : vector<5x32xf32>
    %c4_i32_50 = arith.constant 4 : i32
    %96 = vector.broadcast %c4_i32_50 : i32 to vector<5x32xi32>
    %97 = arith.cmpi slt, %22, %96 : vector<5x32xi32>
    %c8_i32 = arith.constant 8 : i32
    %98 = vector.broadcast %c8_i32 : i32 to vector<5x32xi32>
    %99 = arith.cmpi sge, %22, %98 : vector<5x32xi32>
    %100 = arith.ori %97, %99 : vector<5x32xi1>
    %cst_51 = arith.constant 0.000000e+00 : f32
    %101 = vector.broadcast %cst_51 : f32 to vector<5x32xf32>
    %102 = arith.select %100, %95, %101 : vector<5x32xi1>, vector<5x32xf32>
    %103 = arith.addf %75, %102 : vector<5x32xf32>
    %104 = vector.extract_strided_slice %42 {offsets = [0, 8], sizes = [32, 4], strides = [1, 1]} : vector<32x32xf32> to vector<32x4xf32>
    %105 = arith.truncf %104 : vector<32x4xf32> to vector<32x4xbf16>
    %cst_52 = arith.constant dense<0.000000e+00> : vector<32x32xf32>
    %106 = tpu.matmul %105, %12, %cst_52 {dimension_numbers = #tpu.dot_dimension_numbers<[1], [0], [0], [1], [0, 0, 1, 1], [], []>} : vector<32x4xbf16>, vector<4x32xbf16>, vector<32x32xf32> -> vector<32x32xf32>
    %107 = arith.addf %41, %106 : vector<32x32xf32>
    %108 = vector.broadcast %23 : vector<32x1xf32> to vector<32x32xf32>
    %109 = arith.addf %107, %108 : vector<32x32xf32>
    %cst_53 = arith.constant 0.000000e+00 : f32
    %110 = vector.broadcast %cst_53 : f32 to vector<32x32xf32>
    %111 = arith.maximumf %109, %110 : vector<32x32xf32>
    %112 = arith.truncf %111 : vector<32x32xf32> to vector<32x32xbf16>
    %cst_54 = arith.constant dense<0.000000e+00> : vector<16x32xf32>
    %113 = tpu.matmul %33, %112, %cst_54 {dimension_numbers = #tpu.dot_dimension_numbers<[1], [0], [0], [1], [0, 0, 1, 1], [], []>} : vector<16x32xbf16>, vector<32x32xbf16>, vector<16x32xf32> -> vector<16x32xf32>
    %114 = vector.broadcast %26 : vector<16x1xf32> to vector<16x32xf32>
    %115 = arith.addf %113, %114 : vector<16x32xf32>
    %cst_55 = arith.constant 0.000000e+00 : f32
    %116 = vector.broadcast %cst_55 : f32 to vector<16x32xf32>
    %117 = arith.maximumf %115, %116 : vector<16x32xf32>
    %118 = arith.truncf %117 : vector<16x32xf32> to vector<16x32xbf16>
    %cst_56 = arith.constant dense<0.000000e+00> : vector<5x32xf32>
    %119 = tpu.matmul %36, %118, %cst_56 {dimension_numbers = #tpu.dot_dimension_numbers<[1], [0], [0], [1], [0, 0, 1, 1], [], []>} : vector<5x16xbf16>, vector<16x32xbf16>, vector<5x32xf32> -> vector<5x32xf32>
    %120 = vector.broadcast %29 : vector<5x1xf32> to vector<5x32xf32>
    %121 = arith.addf %119, %120 : vector<5x32xf32>
    %cst_57 = arith.constant 0.000000e+00 : f32
    %122 = vector.broadcast %cst_57 : f32 to vector<5x32xf32>
    %123 = arith.maximumf %121, %122 : vector<5x32xf32>
    %c8_i32_58 = arith.constant 8 : i32
    %124 = vector.broadcast %c8_i32_58 : i32 to vector<5x32xi32>
    %125 = arith.cmpi slt, %22, %124 : vector<5x32xi32>
    %c12_i32 = arith.constant 12 : i32
    %126 = vector.broadcast %c12_i32 : i32 to vector<5x32xi32>
    %127 = arith.cmpi sge, %22, %126 : vector<5x32xi32>
    %128 = arith.ori %125, %127 : vector<5x32xi1>
    %cst_59 = arith.constant 0.000000e+00 : f32
    %129 = vector.broadcast %cst_59 : f32 to vector<5x32xf32>
    %130 = arith.select %128, %123, %129 : vector<5x32xi1>, vector<5x32xf32>
    %131 = arith.addf %103, %130 : vector<5x32xf32>
    %132 = vector.extract_strided_slice %42 {offsets = [0, 12], sizes = [32, 4], strides = [1, 1]} : vector<32x32xf32> to vector<32x4xf32>
    %133 = arith.truncf %132 : vector<32x4xf32> to vector<32x4xbf16>
    %cst_60 = arith.constant dense<0.000000e+00> : vector<32x32xf32>
    %134 = tpu.matmul %133, %12, %cst_60 {dimension_numbers = #tpu.dot_dimension_numbers<[1], [0], [0], [1], [0, 0, 1, 1], [], []>} : vector<32x4xbf16>, vector<4x32xbf16>, vector<32x32xf32> -> vector<32x32xf32>
    %135 = arith.addf %41, %134 : vector<32x32xf32>
    %136 = vector.broadcast %23 : vector<32x1xf32> to vector<32x32xf32>
    %137 = arith.addf %135, %136 : vector<32x32xf32>
    %cst_61 = arith.constant 0.000000e+00 : f32
    %138 = vector.broadcast %cst_61 : f32 to vector<32x32xf32>
    %139 = arith.maximumf %137, %138 : vector<32x32xf32>
    %140 = arith.truncf %139 : vector<32x32xf32> to vector<32x32xbf16>
    %cst_62 = arith.constant dense<0.000000e+00> : vector<16x32xf32>
    %141 = tpu.matmul %33, %140, %cst_62 {dimension_numbers = #tpu.dot_dimension_numbers<[1], [0], [0], [1], [0, 0, 1, 1], [], []>} : vector<16x32xbf16>, vector<32x32xbf16>, vector<16x32xf32> -> vector<16x32xf32>
    %142 = vector.broadcast %26 : vector<16x1xf32> to vector<16x32xf32>
    %143 = arith.addf %141, %142 : vector<16x32xf32>
    %cst_63 = arith.constant 0.000000e+00 : f32
    %144 = vector.broadcast %cst_63 : f32 to vector<16x32xf32>
    %145 = arith.maximumf %143, %144 : vector<16x32xf32>
    %146 = arith.truncf %145 : vector<16x32xf32> to vector<16x32xbf16>
    %cst_64 = arith.constant dense<0.000000e+00> : vector<5x32xf32>
    %147 = tpu.matmul %36, %146, %cst_64 {dimension_numbers = #tpu.dot_dimension_numbers<[1], [0], [0], [1], [0, 0, 1, 1], [], []>} : vector<5x16xbf16>, vector<16x32xbf16>, vector<5x32xf32> -> vector<5x32xf32>
    %148 = vector.broadcast %29 : vector<5x1xf32> to vector<5x32xf32>
    %149 = arith.addf %147, %148 : vector<5x32xf32>
    %cst_65 = arith.constant 0.000000e+00 : f32
    %150 = vector.broadcast %cst_65 : f32 to vector<5x32xf32>
    %151 = arith.maximumf %149, %150 : vector<5x32xf32>
    %c12_i32_66 = arith.constant 12 : i32
    %152 = vector.broadcast %c12_i32_66 : i32 to vector<5x32xi32>
    %153 = arith.cmpi slt, %22, %152 : vector<5x32xi32>
    %c16_i32 = arith.constant 16 : i32
    %154 = vector.broadcast %c16_i32 : i32 to vector<5x32xi32>
    %155 = arith.cmpi sge, %22, %154 : vector<5x32xi32>
    %156 = arith.ori %153, %155 : vector<5x32xi1>
    %cst_67 = arith.constant 0.000000e+00 : f32
    %157 = vector.broadcast %cst_67 : f32 to vector<5x32xf32>
    %158 = arith.select %156, %151, %157 : vector<5x32xi1>, vector<5x32xf32>
    %159 = arith.addf %131, %158 : vector<5x32xf32>
    %160 = vector.extract_strided_slice %42 {offsets = [0, 16], sizes = [32, 4], strides = [1, 1]} : vector<32x32xf32> to vector<32x4xf32>
    %161 = arith.truncf %160 : vector<32x4xf32> to vector<32x4xbf16>
    %cst_68 = arith.constant dense<0.000000e+00> : vector<32x32xf32>
    %162 = tpu.matmul %161, %12, %cst_68 {dimension_numbers = #tpu.dot_dimension_numbers<[1], [0], [0], [1], [0, 0, 1, 1], [], []>} : vector<32x4xbf16>, vector<4x32xbf16>, vector<32x32xf32> -> vector<32x32xf32>
    %163 = arith.addf %41, %162 : vector<32x32xf32>
    %164 = vector.broadcast %23 : vector<32x1xf32> to vector<32x32xf32>
    %165 = arith.addf %163, %164 : vector<32x32xf32>
    %cst_69 = arith.constant 0.000000e+00 : f32
    %166 = vector.broadcast %cst_69 : f32 to vector<32x32xf32>
    %167 = arith.maximumf %165, %166 : vector<32x32xf32>
    %168 = arith.truncf %167 : vector<32x32xf32> to vector<32x32xbf16>
    %cst_70 = arith.constant dense<0.000000e+00> : vector<16x32xf32>
    %169 = tpu.matmul %33, %168, %cst_70 {dimension_numbers = #tpu.dot_dimension_numbers<[1], [0], [0], [1], [0, 0, 1, 1], [], []>} : vector<16x32xbf16>, vector<32x32xbf16>, vector<16x32xf32> -> vector<16x32xf32>
    %170 = vector.broadcast %26 : vector<16x1xf32> to vector<16x32xf32>
    %171 = arith.addf %169, %170 : vector<16x32xf32>
    %cst_71 = arith.constant 0.000000e+00 : f32
    %172 = vector.broadcast %cst_71 : f32 to vector<16x32xf32>
    %173 = arith.maximumf %171, %172 : vector<16x32xf32>
    %174 = arith.truncf %173 : vector<16x32xf32> to vector<16x32xbf16>
    %cst_72 = arith.constant dense<0.000000e+00> : vector<5x32xf32>
    %175 = tpu.matmul %36, %174, %cst_72 {dimension_numbers = #tpu.dot_dimension_numbers<[1], [0], [0], [1], [0, 0, 1, 1], [], []>} : vector<5x16xbf16>, vector<16x32xbf16>, vector<5x32xf32> -> vector<5x32xf32>
    %176 = vector.broadcast %29 : vector<5x1xf32> to vector<5x32xf32>
    %177 = arith.addf %175, %176 : vector<5x32xf32>
    %cst_73 = arith.constant 0.000000e+00 : f32
    %178 = vector.broadcast %cst_73 : f32 to vector<5x32xf32>
    %179 = arith.maximumf %177, %178 : vector<5x32xf32>
    %c16_i32_74 = arith.constant 16 : i32
    %180 = vector.broadcast %c16_i32_74 : i32 to vector<5x32xi32>
    %181 = arith.cmpi slt, %22, %180 : vector<5x32xi32>
    %c20_i32 = arith.constant 20 : i32
    %182 = vector.broadcast %c20_i32 : i32 to vector<5x32xi32>
    %183 = arith.cmpi sge, %22, %182 : vector<5x32xi32>
    %184 = arith.ori %181, %183 : vector<5x32xi1>
    %cst_75 = arith.constant 0.000000e+00 : f32
    %185 = vector.broadcast %cst_75 : f32 to vector<5x32xf32>
    %186 = arith.select %184, %179, %185 : vector<5x32xi1>, vector<5x32xf32>
    %187 = arith.addf %159, %186 : vector<5x32xf32>
    %188 = vector.extract_strided_slice %42 {offsets = [0, 20], sizes = [32, 4], strides = [1, 1]} : vector<32x32xf32> to vector<32x4xf32>
    %189 = arith.truncf %188 : vector<32x4xf32> to vector<32x4xbf16>
    %cst_76 = arith.constant dense<0.000000e+00> : vector<32x32xf32>
    %190 = tpu.matmul %189, %12, %cst_76 {dimension_numbers = #tpu.dot_dimension_numbers<[1], [0], [0], [1], [0, 0, 1, 1], [], []>} : vector<32x4xbf16>, vector<4x32xbf16>, vector<32x32xf32> -> vector<32x32xf32>
    %191 = arith.addf %41, %190 : vector<32x32xf32>
    %192 = vector.broadcast %23 : vector<32x1xf32> to vector<32x32xf32>
    %193 = arith.addf %191, %192 : vector<32x32xf32>
    %cst_77 = arith.constant 0.000000e+00 : f32
    %194 = vector.broadcast %cst_77 : f32 to vector<32x32xf32>
    %195 = arith.maximumf %193, %194 : vector<32x32xf32>
    %196 = arith.truncf %195 : vector<32x32xf32> to vector<32x32xbf16>
    %cst_78 = arith.constant dense<0.000000e+00> : vector<16x32xf32>
    %197 = tpu.matmul %33, %196, %cst_78 {dimension_numbers = #tpu.dot_dimension_numbers<[1], [0], [0], [1], [0, 0, 1, 1], [], []>} : vector<16x32xbf16>, vector<32x32xbf16>, vector<16x32xf32> -> vector<16x32xf32>
    %198 = vector.broadcast %26 : vector<16x1xf32> to vector<16x32xf32>
    %199 = arith.addf %197, %198 : vector<16x32xf32>
    %cst_79 = arith.constant 0.000000e+00 : f32
    %200 = vector.broadcast %cst_79 : f32 to vector<16x32xf32>
    %201 = arith.maximumf %199, %200 : vector<16x32xf32>
    %202 = arith.truncf %201 : vector<16x32xf32> to vector<16x32xbf16>
    %cst_80 = arith.constant dense<0.000000e+00> : vector<5x32xf32>
    %203 = tpu.matmul %36, %202, %cst_80 {dimension_numbers = #tpu.dot_dimension_numbers<[1], [0], [0], [1], [0, 0, 1, 1], [], []>} : vector<5x16xbf16>, vector<16x32xbf16>, vector<5x32xf32> -> vector<5x32xf32>
    %204 = vector.broadcast %29 : vector<5x1xf32> to vector<5x32xf32>
    %205 = arith.addf %203, %204 : vector<5x32xf32>
    %cst_81 = arith.constant 0.000000e+00 : f32
    %206 = vector.broadcast %cst_81 : f32 to vector<5x32xf32>
    %207 = arith.maximumf %205, %206 : vector<5x32xf32>
    %c20_i32_82 = arith.constant 20 : i32
    %208 = vector.broadcast %c20_i32_82 : i32 to vector<5x32xi32>
    %209 = arith.cmpi slt, %22, %208 : vector<5x32xi32>
    %c24_i32 = arith.constant 24 : i32
    %210 = vector.broadcast %c24_i32 : i32 to vector<5x32xi32>
    %211 = arith.cmpi sge, %22, %210 : vector<5x32xi32>
    %212 = arith.ori %209, %211 : vector<5x32xi1>
    %cst_83 = arith.constant 0.000000e+00 : f32
    %213 = vector.broadcast %cst_83 : f32 to vector<5x32xf32>
    %214 = arith.select %212, %207, %213 : vector<5x32xi1>, vector<5x32xf32>
    %215 = arith.addf %187, %214 : vector<5x32xf32>
    %216 = vector.extract_strided_slice %42 {offsets = [0, 24], sizes = [32, 4], strides = [1, 1]} : vector<32x32xf32> to vector<32x4xf32>
    %217 = arith.truncf %216 : vector<32x4xf32> to vector<32x4xbf16>
    %cst_84 = arith.constant dense<0.000000e+00> : vector<32x32xf32>
    %218 = tpu.matmul %217, %12, %cst_84 {dimension_numbers = #tpu.dot_dimension_numbers<[1], [0], [0], [1], [0, 0, 1, 1], [], []>} : vector<32x4xbf16>, vector<4x32xbf16>, vector<32x32xf32> -> vector<32x32xf32>
    %219 = arith.addf %41, %218 : vector<32x32xf32>
    %220 = vector.broadcast %23 : vector<32x1xf32> to vector<32x32xf32>
    %221 = arith.addf %219, %220 : vector<32x32xf32>
    %cst_85 = arith.constant 0.000000e+00 : f32
    %222 = vector.broadcast %cst_85 : f32 to vector<32x32xf32>
    %223 = arith.maximumf %221, %222 : vector<32x32xf32>
    %224 = arith.truncf %223 : vector<32x32xf32> to vector<32x32xbf16>
    %cst_86 = arith.constant dense<0.000000e+00> : vector<16x32xf32>
    %225 = tpu.matmul %33, %224, %cst_86 {dimension_numbers = #tpu.dot_dimension_numbers<[1], [0], [0], [1], [0, 0, 1, 1], [], []>} : vector<16x32xbf16>, vector<32x32xbf16>, vector<16x32xf32> -> vector<16x32xf32>
    %226 = vector.broadcast %26 : vector<16x1xf32> to vector<16x32xf32>
    %227 = arith.addf %225, %226 : vector<16x32xf32>
    %cst_87 = arith.constant 0.000000e+00 : f32
    %228 = vector.broadcast %cst_87 : f32 to vector<16x32xf32>
    %229 = arith.maximumf %227, %228 : vector<16x32xf32>
    %230 = arith.truncf %229 : vector<16x32xf32> to vector<16x32xbf16>
    %cst_88 = arith.constant dense<0.000000e+00> : vector<5x32xf32>
    %231 = tpu.matmul %36, %230, %cst_88 {dimension_numbers = #tpu.dot_dimension_numbers<[1], [0], [0], [1], [0, 0, 1, 1], [], []>} : vector<5x16xbf16>, vector<16x32xbf16>, vector<5x32xf32> -> vector<5x32xf32>
    %232 = vector.broadcast %29 : vector<5x1xf32> to vector<5x32xf32>
    %233 = arith.addf %231, %232 : vector<5x32xf32>
    %cst_89 = arith.constant 0.000000e+00 : f32
    %234 = vector.broadcast %cst_89 : f32 to vector<5x32xf32>
    %235 = arith.maximumf %233, %234 : vector<5x32xf32>
    %c24_i32_90 = arith.constant 24 : i32
    %236 = vector.broadcast %c24_i32_90 : i32 to vector<5x32xi32>
    %237 = arith.cmpi slt, %22, %236 : vector<5x32xi32>
    %c28_i32 = arith.constant 28 : i32
    %238 = vector.broadcast %c28_i32 : i32 to vector<5x32xi32>
    %239 = arith.cmpi sge, %22, %238 : vector<5x32xi32>
    %240 = arith.ori %237, %239 : vector<5x32xi1>
    %cst_91 = arith.constant 0.000000e+00 : f32
    %241 = vector.broadcast %cst_91 : f32 to vector<5x32xf32>
    %242 = arith.select %240, %235, %241 : vector<5x32xi1>, vector<5x32xf32>
    %243 = arith.addf %215, %242 : vector<5x32xf32>
    %244 = vector.extract_strided_slice %42 {offsets = [0, 28], sizes = [32, 4], strides = [1, 1]} : vector<32x32xf32> to vector<32x4xf32>
    %245 = arith.truncf %244 : vector<32x4xf32> to vector<32x4xbf16>
    %cst_92 = arith.constant dense<0.000000e+00> : vector<32x32xf32>
    %246 = tpu.matmul %245, %12, %cst_92 {dimension_numbers = #tpu.dot_dimension_numbers<[1], [0], [0], [1], [0, 0, 1, 1], [], []>} : vector<32x4xbf16>, vector<4x32xbf16>, vector<32x32xf32> -> vector<32x32xf32>
    %247 = arith.addf %41, %246 : vector<32x32xf32>
    %248 = vector.broadcast %23 : vector<32x1xf32> to vector<32x32xf32>
    %249 = arith.addf %247, %248 : vector<32x32xf32>
    %cst_93 = arith.constant 0.000000e+00 : f32
    %250 = vector.broadcast %cst_93 : f32 to vector<32x32xf32>
    %251 = arith.maximumf %249, %250 : vector<32x32xf32>
    %252 = arith.truncf %251 : vector<32x32xf32> to vector<32x32xbf16>
    %cst_94 = arith.constant dense<0.000000e+00> : vector<16x32xf32>
    %253 = tpu.matmul %33, %252, %cst_94 {dimension_numbers = #tpu.dot_dimension_numbers<[1], [0], [0], [1], [0, 0, 1, 1], [], []>} : vector<16x32xbf16>, vector<32x32xbf16>, vector<16x32xf32> -> vector<16x32xf32>
    %254 = vector.broadcast %26 : vector<16x1xf32> to vector<16x32xf32>
    %255 = arith.addf %253, %254 : vector<16x32xf32>
    %cst_95 = arith.constant 0.000000e+00 : f32
    %256 = vector.broadcast %cst_95 : f32 to vector<16x32xf32>
    %257 = arith.maximumf %255, %256 : vector<16x32xf32>
    %258 = arith.truncf %257 : vector<16x32xf32> to vector<16x32xbf16>
    %cst_96 = arith.constant dense<0.000000e+00> : vector<5x32xf32>
    %259 = tpu.matmul %36, %258, %cst_96 {dimension_numbers = #tpu.dot_dimension_numbers<[1], [0], [0], [1], [0, 0, 1, 1], [], []>} : vector<5x16xbf16>, vector<16x32xbf16>, vector<5x32xf32> -> vector<5x32xf32>
    %260 = vector.broadcast %29 : vector<5x1xf32> to vector<5x32xf32>
    %261 = arith.addf %259, %260 : vector<5x32xf32>
    %cst_97 = arith.constant 0.000000e+00 : f32
    %262 = vector.broadcast %cst_97 : f32 to vector<5x32xf32>
    %263 = arith.maximumf %261, %262 : vector<5x32xf32>
    %c28_i32_98 = arith.constant 28 : i32
    %264 = vector.broadcast %c28_i32_98 : i32 to vector<5x32xi32>
    %265 = arith.cmpi slt, %22, %264 : vector<5x32xi32>
    %c32_i32 = arith.constant 32 : i32
    %266 = vector.broadcast %c32_i32 : i32 to vector<5x32xi32>
    %267 = arith.cmpi sge, %22, %266 : vector<5x32xi32>
    %268 = arith.ori %265, %267 : vector<5x32xi1>
    %cst_99 = arith.constant 0.000000e+00 : f32
    %269 = vector.broadcast %cst_99 : f32 to vector<5x32xf32>
    %270 = arith.select %268, %263, %269 : vector<5x32xi1>, vector<5x32xf32>
    %271 = arith.addf %243, %270 : vector<5x32xf32>
    %cst_100 = arith.constant 0.000000e+00 : f32
    %272 = vector.broadcast %cst_100 : f32 to vector<5x32xf32>
    %273 = vector.extract_strided_slice %46 {offsets = [0, 0], sizes = [32, 4], strides = [1, 1]} : vector<32x16xf32> to vector<32x4xf32>
    %274 = arith.truncf %273 : vector<32x4xf32> to vector<32x4xbf16>
    %cst_101 = arith.constant dense<0.000000e+00> : vector<32x32xf32>
    %275 = tpu.matmul %274, %12, %cst_101 {dimension_numbers = #tpu.dot_dimension_numbers<[1], [0], [0], [1], [0, 0, 1, 1], [], []>} : vector<32x4xbf16>, vector<4x32xbf16>, vector<32x32xf32> -> vector<32x32xf32>
    %276 = arith.addf %43, %275 : vector<32x32xf32>
    %277 = vector.broadcast %24 : vector<32x1xf32> to vector<32x32xf32>
    %278 = arith.addf %276, %277 : vector<32x32xf32>
    %cst_102 = arith.constant 0.000000e+00 : f32
    %279 = vector.broadcast %cst_102 : f32 to vector<32x32xf32>
    %280 = arith.maximumf %278, %279 : vector<32x32xf32>
    %281 = arith.truncf %280 : vector<32x32xf32> to vector<32x32xbf16>
    %cst_103 = arith.constant dense<0.000000e+00> : vector<16x32xf32>
    %282 = tpu.matmul %34, %281, %cst_103 {dimension_numbers = #tpu.dot_dimension_numbers<[1], [0], [0], [1], [0, 0, 1, 1], [], []>} : vector<16x32xbf16>, vector<32x32xbf16>, vector<16x32xf32> -> vector<16x32xf32>
    %283 = vector.broadcast %27 : vector<16x1xf32> to vector<16x32xf32>
    %284 = arith.addf %282, %283 : vector<16x32xf32>
    %cst_104 = arith.constant 0.000000e+00 : f32
    %285 = vector.broadcast %cst_104 : f32 to vector<16x32xf32>
    %286 = arith.maximumf %284, %285 : vector<16x32xf32>
    %287 = arith.truncf %286 : vector<16x32xf32> to vector<16x32xbf16>
    %cst_105 = arith.constant dense<0.000000e+00> : vector<5x32xf32>
    %288 = tpu.matmul %37, %287, %cst_105 {dimension_numbers = #tpu.dot_dimension_numbers<[1], [0], [0], [1], [0, 0, 1, 1], [], []>} : vector<5x16xbf16>, vector<16x32xbf16>, vector<5x32xf32> -> vector<5x32xf32>
    %289 = vector.broadcast %30 : vector<5x1xf32> to vector<5x32xf32>
    %290 = arith.addf %288, %289 : vector<5x32xf32>
    %cst_106 = arith.constant 0.000000e+00 : f32
    %291 = vector.broadcast %cst_106 : f32 to vector<5x32xf32>
    %292 = arith.maximumf %290, %291 : vector<5x32xf32>
    %293 = arith.addf %272, %292 : vector<5x32xf32>
    %294 = vector.extract_strided_slice %46 {offsets = [0, 4], sizes = [32, 4], strides = [1, 1]} : vector<32x16xf32> to vector<32x4xf32>
    %295 = arith.truncf %294 : vector<32x4xf32> to vector<32x4xbf16>
    %cst_107 = arith.constant dense<0.000000e+00> : vector<32x32xf32>
    %296 = tpu.matmul %295, %12, %cst_107 {dimension_numbers = #tpu.dot_dimension_numbers<[1], [0], [0], [1], [0, 0, 1, 1], [], []>} : vector<32x4xbf16>, vector<4x32xbf16>, vector<32x32xf32> -> vector<32x32xf32>
    %297 = arith.addf %43, %296 : vector<32x32xf32>
    %298 = vector.broadcast %24 : vector<32x1xf32> to vector<32x32xf32>
    %299 = arith.addf %297, %298 : vector<32x32xf32>
    %cst_108 = arith.constant 0.000000e+00 : f32
    %300 = vector.broadcast %cst_108 : f32 to vector<32x32xf32>
    %301 = arith.maximumf %299, %300 : vector<32x32xf32>
    %302 = arith.truncf %301 : vector<32x32xf32> to vector<32x32xbf16>
    %cst_109 = arith.constant dense<0.000000e+00> : vector<16x32xf32>
    %303 = tpu.matmul %34, %302, %cst_109 {dimension_numbers = #tpu.dot_dimension_numbers<[1], [0], [0], [1], [0, 0, 1, 1], [], []>} : vector<16x32xbf16>, vector<32x32xbf16>, vector<16x32xf32> -> vector<16x32xf32>
    %304 = vector.broadcast %27 : vector<16x1xf32> to vector<16x32xf32>
    %305 = arith.addf %303, %304 : vector<16x32xf32>
    %cst_110 = arith.constant 0.000000e+00 : f32
    %306 = vector.broadcast %cst_110 : f32 to vector<16x32xf32>
    %307 = arith.maximumf %305, %306 : vector<16x32xf32>
    %308 = arith.truncf %307 : vector<16x32xf32> to vector<16x32xbf16>
    %cst_111 = arith.constant dense<0.000000e+00> : vector<5x32xf32>
    %309 = tpu.matmul %37, %308, %cst_111 {dimension_numbers = #tpu.dot_dimension_numbers<[1], [0], [0], [1], [0, 0, 1, 1], [], []>} : vector<5x16xbf16>, vector<16x32xbf16>, vector<5x32xf32> -> vector<5x32xf32>
    %310 = vector.broadcast %30 : vector<5x1xf32> to vector<5x32xf32>
    %311 = arith.addf %309, %310 : vector<5x32xf32>
    %cst_112 = arith.constant 0.000000e+00 : f32
    %312 = vector.broadcast %cst_112 : f32 to vector<5x32xf32>
    %313 = arith.maximumf %311, %312 : vector<5x32xf32>
    %314 = arith.addf %293, %313 : vector<5x32xf32>
    %315 = vector.extract_strided_slice %46 {offsets = [0, 8], sizes = [32, 4], strides = [1, 1]} : vector<32x16xf32> to vector<32x4xf32>
    %316 = arith.truncf %315 : vector<32x4xf32> to vector<32x4xbf16>
    %cst_113 = arith.constant dense<0.000000e+00> : vector<32x32xf32>
    %317 = tpu.matmul %316, %12, %cst_113 {dimension_numbers = #tpu.dot_dimension_numbers<[1], [0], [0], [1], [0, 0, 1, 1], [], []>} : vector<32x4xbf16>, vector<4x32xbf16>, vector<32x32xf32> -> vector<32x32xf32>
    %318 = arith.addf %43, %317 : vector<32x32xf32>
    %319 = vector.broadcast %24 : vector<32x1xf32> to vector<32x32xf32>
    %320 = arith.addf %318, %319 : vector<32x32xf32>
    %cst_114 = arith.constant 0.000000e+00 : f32
    %321 = vector.broadcast %cst_114 : f32 to vector<32x32xf32>
    %322 = arith.maximumf %320, %321 : vector<32x32xf32>
    %323 = arith.truncf %322 : vector<32x32xf32> to vector<32x32xbf16>
    %cst_115 = arith.constant dense<0.000000e+00> : vector<16x32xf32>
    %324 = tpu.matmul %34, %323, %cst_115 {dimension_numbers = #tpu.dot_dimension_numbers<[1], [0], [0], [1], [0, 0, 1, 1], [], []>} : vector<16x32xbf16>, vector<32x32xbf16>, vector<16x32xf32> -> vector<16x32xf32>
    %325 = vector.broadcast %27 : vector<16x1xf32> to vector<16x32xf32>
    %326 = arith.addf %324, %325 : vector<16x32xf32>
    %cst_116 = arith.constant 0.000000e+00 : f32
    %327 = vector.broadcast %cst_116 : f32 to vector<16x32xf32>
    %328 = arith.maximumf %326, %327 : vector<16x32xf32>
    %329 = arith.truncf %328 : vector<16x32xf32> to vector<16x32xbf16>
    %cst_117 = arith.constant dense<0.000000e+00> : vector<5x32xf32>
    %330 = tpu.matmul %37, %329, %cst_117 {dimension_numbers = #tpu.dot_dimension_numbers<[1], [0], [0], [1], [0, 0, 1, 1], [], []>} : vector<5x16xbf16>, vector<16x32xbf16>, vector<5x32xf32> -> vector<5x32xf32>
    %331 = vector.broadcast %30 : vector<5x1xf32> to vector<5x32xf32>
    %332 = arith.addf %330, %331 : vector<5x32xf32>
    %cst_118 = arith.constant 0.000000e+00 : f32
    %333 = vector.broadcast %cst_118 : f32 to vector<5x32xf32>
    %334 = arith.maximumf %332, %333 : vector<5x32xf32>
    %335 = arith.addf %314, %334 : vector<5x32xf32>
    %336 = vector.extract_strided_slice %46 {offsets = [0, 12], sizes = [32, 4], strides = [1, 1]} : vector<32x16xf32> to vector<32x4xf32>
    %337 = arith.truncf %336 : vector<32x4xf32> to vector<32x4xbf16>
    %cst_119 = arith.constant dense<0.000000e+00> : vector<32x32xf32>
    %338 = tpu.matmul %337, %12, %cst_119 {dimension_numbers = #tpu.dot_dimension_numbers<[1], [0], [0], [1], [0, 0, 1, 1], [], []>} : vector<32x4xbf16>, vector<4x32xbf16>, vector<32x32xf32> -> vector<32x32xf32>
    %339 = arith.addf %43, %338 : vector<32x32xf32>
    %340 = vector.broadcast %24 : vector<32x1xf32> to vector<32x32xf32>
    %341 = arith.addf %339, %340 : vector<32x32xf32>
    %cst_120 = arith.constant 0.000000e+00 : f32
    %342 = vector.broadcast %cst_120 : f32 to vector<32x32xf32>
    %343 = arith.maximumf %341, %342 : vector<32x32xf32>
    %344 = arith.truncf %343 : vector<32x32xf32> to vector<32x32xbf16>
    %cst_121 = arith.constant dense<0.000000e+00> : vector<16x32xf32>
    %345 = tpu.matmul %34, %344, %cst_121 {dimension_numbers = #tpu.dot_dimension_numbers<[1], [0], [0], [1], [0, 0, 1, 1], [], []>} : vector<16x32xbf16>, vector<32x32xbf16>, vector<16x32xf32> -> vector<16x32xf32>
    %346 = vector.broadcast %27 : vector<16x1xf32> to vector<16x32xf32>
    %347 = arith.addf %345, %346 : vector<16x32xf32>
    %cst_122 = arith.constant 0.000000e+00 : f32
    %348 = vector.broadcast %cst_122 : f32 to vector<16x32xf32>
    %349 = arith.maximumf %347, %348 : vector<16x32xf32>
    %350 = arith.truncf %349 : vector<16x32xf32> to vector<16x32xbf16>
    %cst_123 = arith.constant dense<0.000000e+00> : vector<5x32xf32>
    %351 = tpu.matmul %37, %350, %cst_123 {dimension_numbers = #tpu.dot_dimension_numbers<[1], [0], [0], [1], [0, 0, 1, 1], [], []>} : vector<5x16xbf16>, vector<16x32xbf16>, vector<5x32xf32> -> vector<5x32xf32>
    %352 = vector.broadcast %30 : vector<5x1xf32> to vector<5x32xf32>
    %353 = arith.addf %351, %352 : vector<5x32xf32>
    %cst_124 = arith.constant 0.000000e+00 : f32
    %354 = vector.broadcast %cst_124 : f32 to vector<5x32xf32>
    %355 = arith.maximumf %353, %354 : vector<5x32xf32>
    %356 = arith.addf %335, %355 : vector<5x32xf32>
    %c0_125 = arith.constant 0 : index
    %c0_126 = arith.constant 0 : index
    %357 = vector.load %arg7[%c0_125, %c0_126] : memref<64x5xbf16, #tpu.memory_space<vmem>>, vector<32x5xbf16>
    %c32_127 = arith.constant 32 : index
    %c0_128 = arith.constant 0 : index
    %358 = vector.load %arg7[%c32_127, %c0_128] : memref<64x5xbf16, #tpu.memory_space<vmem>>, vector<32x5xbf16>
    %359 = arith.truncf %271 : vector<5x32xf32> to vector<5x32xbf16>
    %cst_129 = arith.constant dense<0.000000e+00> : vector<32x32xf32>
    %360 = tpu.matmul %357, %359, %cst_129 {dimension_numbers = #tpu.dot_dimension_numbers<[1], [0], [0], [1], [0, 0, 1, 1], [], []>} : vector<32x5xbf16>, vector<5x32xbf16>, vector<32x32xf32> -> vector<32x32xf32>
    %361 = arith.addf %44, %360 : vector<32x32xf32>
    %362 = arith.truncf %356 : vector<5x32xf32> to vector<5x32xbf16>
    %cst_130 = arith.constant dense<0.000000e+00> : vector<32x32xf32>
    %363 = tpu.matmul %358, %362, %cst_130 {dimension_numbers = #tpu.dot_dimension_numbers<[1], [0], [0], [1], [0, 0, 1, 1], [], []>} : vector<32x5xbf16>, vector<5x32xbf16>, vector<32x32xf32> -> vector<32x32xf32>
    %364 = arith.addf %361, %363 : vector<32x32xf32>
    %365 = vector.broadcast %25 : vector<32x1xf32> to vector<32x32xf32>
    %366 = arith.addf %364, %365 : vector<32x32xf32>
    %cst_131 = arith.constant 0.000000e+00 : f32
    %367 = vector.broadcast %cst_131 : f32 to vector<32x32xf32>
    %368 = arith.maximumf %366, %367 : vector<32x32xf32>
    %369 = arith.truncf %368 : vector<32x32xf32> to vector<32x32xbf16>
    %cst_132 = arith.constant dense<0.000000e+00> : vector<16x32xf32>
    %370 = tpu.matmul %35, %369, %cst_132 {dimension_numbers = #tpu.dot_dimension_numbers<[1], [0], [0], [1], [0, 0, 1, 1], [], []>} : vector<16x32xbf16>, vector<32x32xbf16>, vector<16x32xf32> -> vector<16x32xf32>
    %371 = vector.broadcast %28 : vector<16x1xf32> to vector<16x32xf32>
    %372 = arith.addf %370, %371 : vector<16x32xf32>
    %cst_133 = arith.constant 0.000000e+00 : f32
    %373 = vector.broadcast %cst_133 : f32 to vector<16x32xf32>
    %374 = arith.maximumf %372, %373 : vector<16x32xf32>
    %375 = arith.truncf %374 : vector<16x32xf32> to vector<16x32xbf16>
    %cst_134 = arith.constant dense<0.000000e+00> : vector<6x32xf32>
    %376 = tpu.matmul %38, %375, %cst_134 {dimension_numbers = #tpu.dot_dimension_numbers<[1], [0], [0], [1], [0, 0, 1, 1], [], []>} : vector<6x16xbf16>, vector<16x32xbf16>, vector<6x32xf32> -> vector<6x32xf32>
    %377 = vector.broadcast %31 : vector<6x1xf32> to vector<6x32xf32>
    %378 = arith.addf %376, %377 : vector<6x32xf32>
    %cst_135 = arith.constant 0.000000e+00 : f32
    %379 = vector.broadcast %cst_135 : f32 to vector<6x32xf32>
    %380 = arith.maximumf %378, %379 : vector<6x32xf32>
    %381 = arith.truncf %380 : vector<6x32xf32> to vector<6x32xbf16>
    %cst_136 = arith.constant dense<0.000000e+00> : vector<6x4xf32>
    %382 = tpu.matmul %381, %21, %cst_136 {dimension_numbers = #tpu.dot_dimension_numbers<[1], [0], [0], [1], [0, 0, 1, 1], [], []>} : vector<6x32xbf16>, vector<32x4xbf16>, vector<6x4xf32> -> vector<6x4xf32>
    %c0_137 = arith.constant 0 : index
    %c0_138 = arith.constant 0 : index
    %383 = vector.load %arg8[%c0_137, %c0_138] : memref<3x6xbf16, #tpu.memory_space<vmem>>, vector<3x6xbf16>
    %384 = arith.truncf %382 : vector<6x4xf32> to vector<6x4xbf16>
    %cst_139 = arith.constant dense<0.000000e+00> : vector<3x4xf32>
    %385 = tpu.matmul %383, %384, %cst_139 {dimension_numbers = #tpu.dot_dimension_numbers<[1], [0], [0], [1], [0, 0, 1, 1], [], []>} : vector<3x6xbf16>, vector<6x4xbf16>, vector<3x4xf32> -> vector<3x4xf32>
    %386 = vector.broadcast %32 : vector<3x1xf32> to vector<3x4xf32>
    %387 = arith.addf %385, %386 : vector<3x4xf32>
    %c0_140 = arith.constant 0 : index
    %c0_141 = arith.constant 0 : index
    %c0_142 = arith.constant 0 : index
    %388 = vector.load %arg11[%c0_140, %c0_141, %c0_142] : memref<1x6x4xf32, #tpu.memory_space<vmem>>, vector<1x6x4xf32>
    %389 = vector.shape_cast %388 : vector<1x6x4xf32> to vector<6x4xf32>
    %390 = vector.shape_cast %382 : vector<6x4xf32> to vector<1x6x4xf32>
    tpu.vector_store %arg11[%c0_140, %c0_141, %c0_142], %390 {strides = array<i32>} : memref<1x6x4xf32, #tpu.memory_space<vmem>>, vector<1x6x4xf32>,
    %c0_143 = arith.constant 0 : index
    %c0_144 = arith.constant 0 : index
    %c0_145 = arith.constant 0 : index
    %391 = vector.load %arg10[%c0_143, %c0_144, %c0_145] : memref<1x3x4xf32, #tpu.memory_space<vmem>>, vector<1x3x4xf32>
    %392 = vector.shape_cast %391 : vector<1x3x4xf32> to vector<3x4xf32>
    %393 = vector.shape_cast %387 : vector<3x4xf32> to vector<1x3x4xf32>
    tpu.vector_store %arg10[%c0_143, %c0_144, %c0_145], %393 {strides = array<i32>} : memref<1x3x4xf32, #tpu.memory_space<vmem>>, vector<1x3x4xf32>,
    return
  }
  func.func @transform_0(%arg0: i32) -> (i32, i32, i32) {
    %c0_i32 = arith.constant 0 : i32
    %c0_i32_0 = arith.constant 0 : i32
    %c0_i32_1 = arith.constant 0 : i32
    return %arg0, %c0_i32, %c0_i32_0 : i32, i32, i32
  }
  func.func @transform_1(%arg0: i32) -> (i32, i32, i32) {
    %c0_i32 = arith.constant 0 : i32
    %c0_i32_0 = arith.constant 0 : i32
    %c0_i32_1 = arith.constant 0 : i32
    return %arg0, %c0_i32, %c0_i32_0 : i32, i32, i32
  }
  func.func @transform_2(%arg0: i32) -> (i32, i32) {
    %c0_i32 = arith.constant 0 : i32
    %c0_i32_0 = arith.constant 0 : i32
    %c0_i32_1 = arith.constant 0 : i32
    return %c0_i32, %c0_i32_0 : i32, i32
  }
  func.func @transform_3(%arg0: i32) -> (i32, i32) {
    %c0_i32 = arith.constant 0 : i32
    %c0_i32_0 = arith.constant 0 : i32
    %c0_i32_1 = arith.constant 0 : i32
    return %c0_i32, %c0_i32_0 : i32, i32
  }
  func.func @transform_4(%arg0: i32) -> (i32, i32) {
    %c0_i32 = arith.constant 0 : i32
    %c0_i32_0 = arith.constant 0 : i32
    %c0_i32_1 = arith.constant 0 : i32
    return %c0_i32, %c0_i32_0 : i32, i32
  }
  func.func @transform_5(%arg0: i32) -> (i32, i32) {
    %c0_i32 = arith.constant 0 : i32
    %c0_i32_0 = arith.constant 0 : i32
    %c0_i32_1 = arith.constant 0 : i32
    return %c0_i32, %c0_i32_0 : i32, i32
  }
  func.func @transform_6(%arg0: i32) -> (i32, i32) {
    %c0_i32 = arith.constant 0 : i32
    %c0_i32_0 = arith.constant 0 : i32
    %c0_i32_1 = arith.constant 0 : i32
    return %c0_i32, %c0_i32_0 : i32, i32
  }
  func.func @transform_7(%arg0: i32) -> (i32, i32) {
    %c0_i32 = arith.constant 0 : i32
    %c0_i32_0 = arith.constant 0 : i32
    %c0_i32_1 = arith.constant 0 : i32
    return %c0_i32, %c0_i32_0 : i32, i32
  }
  func.func @transform_8(%arg0: i32) -> (i32, i32) {
    %c0_i32 = arith.constant 0 : i32
    %c0_i32_0 = arith.constant 0 : i32
    %c0_i32_1 = arith.constant 0 : i32
    return %c0_i32, %c0_i32_0 : i32, i32
  }
  func.func @transform_9(%arg0: i32) -> (i32, i32, i32) {
    %c0_i32 = arith.constant 0 : i32
    %c0_i32_0 = arith.constant 0 : i32
    %c0_i32_1 = arith.constant 0 : i32
    return %arg0, %c0_i32, %c0_i32_0 : i32, i32, i32
  }
  func.func @transform_10(%arg0: i32) -> (i32, i32, i32) {
    %c0_i32 = arith.constant 0 : i32
    %c0_i32_0 = arith.constant 0 : i32
    %c0_i32_1 = arith.constant 0 : i32
    return %arg0, %c0_i32, %c0_i32_0 : i32, i32, i32
  }
}

</mosaic_0001>

<bundles_post_ra>
// kernel: _lambda_.1
= control target key start
LH: loop header
LB: loop body
LE: loop exit
PB: predicated region body
PF: predicated region fallthrough
CT: control target
= control target key end

     0   :  { %16 = vsyncpa [#allocation3], 0  ;;  %s4939_s0 = inlined_call_operand.vmem [shape: bf16[2,4,32], index: 0, kind: input, shape index: {}]   ;;  %s4940_s1 = inlined_call_operand.vmem [shape: bf16[2,4,16], index: 1, kind: input, shape index: {}]   ;;  %s4941_s2 = inlined_call_operand.vmem [shape: bf16[128,4], index: 2, kind: input, shape index: {}]   ;;  %s4942_s3 = inlined_call_operand.hbm [shape: bf16[32,4], index: 3, kind: input, shape index: {}]   ;;  %s4943_s4 = inlined_call_operand.hbm [shape: bf16[48,32], index: 4, kind: input, shape index: {}]   ;;  %s4944_s5 = inlined_call_operand.hbm [shape: bf16[24,16], index: 5, kind: input, shape index: {}]   ;;  %s4945_s6 = inlined_call_operand.vmem [shape: bf16[64,5], index: 6, kind: input, shape index: {}]   ;;  %s4946_s7 = inlined_call_operand.hbm [shape: bf16[3,6], index: 7, kind: input, shape index: {}]   ;;  %s4947_s8 = inlined_call_operand.vmem [shape: f32[176,1], index: 8, kind: input, shape index: {}]   ;;  %s4948_s9 = inlined_call_operand.vmem [shape: f32[2,3,4], index: 9, kind: output, shape index: {0}]   ;;  %s4949_s10 = inlined_call_operand.vmem [shape: f32[2,6,4], index: 10, kind: output, shape index: {1}]  }
   0x1   :  { %17 = vsyncpa [#allocation5], 0 }
   0x2   :  { %18 = vsyncpa [#allocation8], 0  ;;  %s4171_s13 = smov 0  }
   0x3 LB: > { %s4177_s14 = sadd.s32 4294967295, %s4096_s13   ;;  %p3330_p0 = scmp.ge.s32.totalorder %s4096_s13, 1  ;;  %s4096_s13 = sphi %s4171_s13, %s24_s13  }
   0x4   : > { %p280_p1 = scmp.lt.s32.totalorder %s4096_s13, 3  ;;  %p4950_p2 = scmp.eq.s32.totalorder %s4177_s14, 0 }
   0x5   : > { %s4098_s16 = smov [#allocation4]   ;;  %s4099_s18 = smov [#allocation2]  }
   0x6   : > { %p4182_p3 = pnand %p3330_p0, %p280_p1  ;;  %s308_s17 = sshll.u32 %s4098_s16, 4  ;;  %s4186_s17 = int_to_ptr.vmem [resolvable:$true] %s308_s17 }
   0x7   : > { %s295_s19 = sshll.u32 %s4099_s18, 4  ;;  %s4100_s21 = smov [#allocation6]   ;;  %s4190_s19 = int_to_ptr.vmem [resolvable:$true] %s295_s19 }
   0x8   : > { %s4952_s15 = scalar_select %p4182_p3, 1, 0 }
   0x9   : > { %p3900_p4 = pneg %p4182_p3  ;;  %s321_s22 = sshll.u32 %s4100_s21, 4  ;;  %s4198_s22 = int_to_ptr.vmem [resolvable:$true] %s321_s22 }
   0xa   : > { %s4101_s23 = smov [#allocation7]   ;;  %s3966_s27 = scalar_lea.hbm %s4943_s4, 384 }
   0xb   : > { %p4194_p5 = pnand %p4950_p2, %p3900_p4  ;;  %s4200_s24 = sshll.u32 %s4101_s23, 4  ;;  %s339_s24 = int_to_ptr.vmem [resolvable:$true] %s4200_s24 }
   0xc   : > { %p3967_p6 = scmp.ne.s32.totalorder %s4943_s4, %s3966_s27  ;;  %p3973_p10 = scmp.lt.u32.totalorder %s3966_s27, %s4943_s4 }
   0xd   : > { %p4210_p7 = pneg %p4194_p5 }
   0xf   : > { %p3969_p8 = pnand %p4210_p7, %p3967_p6 }
  0x11   : > { %p3970_p9 = pneg %p3969_p8 }
  0x13   : > { %p3975_p11 = pnand %p3973_p10, %p3970_p9 }
  0x15   : > { %3978 = shalt.err (!%p3975_p11)
}
  0x16   : > { %s3979_s16 = scalar_lea.vmem %s4186_s17, 384  ;;  %p3987_p1 = scmp.lt.s32.totalorder %s4186_s17, %s4186_s17 }
  0x17   : > { %p3980_p12 = scmp.ne.s32.totalorder %s4186_s17, %s3979_s16  ;;  %p3988_p4 = scmp.lt.s32.totalorder %s3979_s16, %s3979_s16 }
  0x19   : > { %p3982_p13 = pnand %p3980_p12, %p4210_p7  ;;  %p3989_p6 = por %p3988_p4, %p3987_p1 }
  0x1b   : > { %p3983_p0 = pneg %p3982_p13 }
  0x1d   : > { %p3990_p8 = pnand %p3989_p6, %p3983_p0 }
  0x1f   : > { %3993 = shalt.err (!%p3990_p8)
}
  0x20   : > { %s4102_s18 = smov 64   ;;  %s4103_s21 = smov 4  }
  0x21   : > { %3906 = dma.hbm_to_vmem [thread:$0]  (!%p4194_p5), %s4943_s4, 384, %s4186_s17, [#allocation5], %s4102_s18, %s4102_s18, %s4103_s21  }
  0x22   : > { %s3994_s28 = scalar_lea.hbm %s4942_s3, 256 }
  0x23   : > { %p3995_p9 = scmp.ne.s32.totalorder %s4942_s3, %s3994_s28  ;;  %p4001_p12 = scmp.lt.u32.totalorder %s3994_s28, %s4942_s3 }
  0x25   : > { %p3997_p10 = pnand %p3995_p9, %p4210_p7 }
  0x27   : > { %p3998_p11 = pneg %p3997_p10 }
  0x29   : > { %p4003_p13 = pnand %p4001_p12, %p3998_p11 }
  0x2b   : > { %4006 = shalt.err (!%p4003_p13)
}
  0x2c   : > { %s4007_s17 = scalar_lea.vmem %s4190_s19, 256  ;;  %p4015_p6 = scmp.lt.s32.totalorder %s4190_s19, %s4190_s19 }
  0x2d   : > { %p4008_p0 = scmp.ne.s32.totalorder %s4190_s19, %s4007_s17  ;;  %p4016_p8 = scmp.lt.s32.totalorder %s4007_s17, %s4007_s17 }
  0x2f   : > { %p4010_p1 = pnand %p4008_p0, %p4210_p7  ;;  %p4017_p9 = por %p4016_p8, %p4015_p6 }
  0x31   : > { %p4011_p4 = pneg %p4010_p1 }
  0x33   : > { %p4018_p10 = pnand %p4017_p9, %p4011_p4 }
  0x35   : > { %4021 = shalt.err (!%p4018_p10)
}
  0x36   : > { %3903 = dma.hbm_to_vmem [thread:$0]  (!%p4194_p5), %s4942_s3, 256, %s4190_s19, [#allocation3], %s4102_s18, %s4102_s18, %s4103_s21  }
  0x37   : > { %s4022_s28 = scalar_lea.hbm %s4944_s5, 192 }
  0x38   : > { %p4023_p11 = scmp.ne.s32.totalorder %s4944_s5, %s4022_s28  ;;  %p4029_p0 = scmp.lt.u32.totalorder %s4022_s28, %s4944_s5 }
  0x3a   : > { %p4025_p12 = pnand %p4023_p11, %p4210_p7 }
  0x3c   : > { %p4026_p13 = pneg %p4025_p12 }
  0x3e   : > { %p4031_p1 = pnand %p4029_p0, %p4026_p13 }
  0x40   : > { %4034 = shalt.err (!%p4031_p1)
}
  0x41   : > { %s4035_s19 = scalar_lea.vmem %s4198_s22, 192  ;;  %p4043_p9 = scmp.lt.s32.totalorder %s4198_s22, %s4198_s22 }
  0x42   : > { %p4036_p4 = scmp.ne.s32.totalorder %s4198_s22, %s4035_s19  ;;  %p4044_p10 = scmp.lt.s32.totalorder %s4035_s19, %s4035_s19 }
  0x44   : > { %p4038_p6 = pnand %p4036_p4, %p4210_p7  ;;  %p4045_p11 = por %p4044_p10, %p4043_p9 }
  0x46   : > { %p4039_p8 = pneg %p4038_p6 }
  0x48   : > { %p4046_p12 = pnand %p4045_p11, %p4039_p8 }
  0x4a   : > { %4049 = shalt.err (!%p4046_p12)
}
  0x4b   : > { %3909 = dma.hbm_to_vmem [thread:$0]  (!%p4194_p5), %s4944_s5, 192, %s4198_s22, [#allocation5], %s4102_s18, %s4102_s18, %s4103_s21  }
  0x4c   : > { %s4050_s27 = scalar_lea.hbm %s4946_s7, 32 }
  0x4d   : > { %p4051_p13 = scmp.ne.s32.totalorder %s4946_s7, %s4050_s27  ;;  %p4057_p4 = scmp.lt.u32.totalorder %s4050_s27, %s4946_s7 }
  0x4f   : > { %p4053_p0 = pnand %p4051_p13, %p4210_p7 }
  0x51   : > { %p4054_p1 = pneg %p4053_p0 }
  0x53   : > { %p4059_p6 = pnand %p4057_p4, %p4054_p1 }
  0x55   : > { %4062 = shalt.err (!%p4059_p6)
}
  0x56   : > { %s4063_s16 = scalar_lea.vmem %s339_s24, 32  ;;  %p4071_p11 = scmp.lt.s32.totalorder %s339_s24, %s339_s24 }
  0x57   : > { %p4064_p8 = scmp.ne.s32.totalorder %s339_s24, %s4063_s16  ;;  %p4072_p12 = scmp.lt.s32.totalorder %s4063_s16, %s4063_s16 }
  0x59   : > { %p4066_p9 = pnand %p4064_p8, %p4210_p7  ;;  %p4073_p2 = por %p4072_p12, %p4071_p11 }
  0x5b   : > { %p4067_p10 = pneg %p4066_p9 }
  0x5d   : > { %p4074_p3 = pnand %p4073_p2, %p4067_p10 }
  0x5f   : > { %4077 = shalt.err (!%p4074_p3)
}
  0x60   : > { %3912 = dma.hbm_to_vmem [thread:$0]  (!%p4194_p5), %s4946_s7, 32, %s339_s24, [#allocation8]  }
  0x61   : > { %p4955_p13 = scmp.ne.s32.totalorder %s4952_s15, 0 }
  0x62   : > { %p4956_p0 = scmp.eq.s32.totalorder (!%p4955_p13), %s4177_s14, 0 }
  0x63   : > { %368 = sbr.rel (%p4955_p13) target bundleno = 4741 (0x1285), region = 56 }
  0x6a   : > { %4083 = dma.done.wait (%p4956_p0), [#allocation3], 256   ;;  %p4957_p7 = pmov %p4956_p0 }
  0x6b   : > { %p4958_p1 = pmov %p4956_p0 }
  0x6c   : > { %4085 = vsyncadd (%p4957_p7), [#allocation3], 4294967040 }
  0x6d   : > { %4087 = dma.done.wait (%p4958_p1), [#allocation5], 576   ;;  %p4959_p2 = pmov %p4956_p0 }
  0x6e   : > { %p4960_p3 = pmov %p4956_p0 }
  0x6f   : > { %4089 = vsyncadd (%p4959_p2), [#allocation5], 4294966720 }
  0x70   : > { %4091 = dma.done.wait (%p4960_p3), [#allocation8], 32   ;;  %p4961_p5 = pmov %p4956_p0 }
  0x71   : > { %p424_p4 = scmp.lt.s32.totalorder %s4177_s14, 1  ;;  %v4104_v0 = vmov 0   ;;  %vm580_vm0 = vcmask 1041408   ;;  %vm555_vm1 = vcmask 31744   ;;  %v3949_v3 = vld [vmem:[%s4941_s2] sm:$0xff]   ;;  %v3950_v4 = vld [vmem:[%s4941_s2 + $0x8] sm:$0xff]   ;;  %v443_v15 = vlaneseq }
  0x72   : > { %4093 = vsyncadd (%p4961_p5), [#allocation8], 4294967264  ;;  %3948 = vset.pattern.permute.xlu1 %v4104_v0  ;;  %3947 = vset.pattern.permute.xlu0 %v4104_v0  ;;  %v3951_v5 = vld [vmem:[%s4941_s2 + $0x10] sm:$0xff]   ;;  %v3953_v8 = vld [vmem:[#allocation2] sm:$0xff]   ;;  %v4105_v19 = vmov 0.0   ;;  %s4106_s11 = smov 124  }
  0x73   : > { %s4963_s14 = smov (!%p424_p4, %s4177_s14), 1  ;;  %3560 = vmatprep.mubr.msk.bf16.mxu0 %vm555_vm1, %v3949_v3  ;;  %v3954_v9 = vld [vmem:[#allocation2 + $0x8] sm:$0xff]   ;;  %v470_v10 = vld [vmem:[%s4947_s8 + $0x10] sm:$0xff]  ;;  %v3952_v11 = vld [vmem:[%s4941_s2 + $0x18] sm:$0xff]   ;;  %3578 = vmatprep.mubr.msk.bf16.mxu1 %vm555_vm1, %v3953_v8  ;;  %v4364_v16 = vand.u32 127, %v443_v15  ;;  %v4366_v17 = vshrl.u32 %v443_v15, 7 }
  0x74   : > { %s3341_s15 = sshll.u32 %s4963_s14, 1  ;;  %829 = vperm.xlu1 %3948, %v470_v10   ;;  %v468_v12 = vld [vmem:[%s4947_s8] sm:$0xff]  ;;  %v471_v13 = vld [vmem:[%s4947_s8 + $0x18] sm:$0xff]  ;;  %v469_v14 = vld [vmem:[%s4947_s8 + $0x8] sm:$0xff]  ;;  %s4108_s20 = smov 116   ;;  %vm4113_vm3 = vmmov 0  }
  0x75   : > { %s427_s30 = scalar_lea.vmem %s4939_s0, %s3341_s15  ;;  %s431_s25 = scalar_lea.vmem %s4940_s1, %s3341_s15  ;;  %819 = vperm.xlu0 %3947, %v468_v12   ;;  %v447_v18 = vand.u32 3, %v4364_v16  ;;  %v3955_v23 = vld [vmem:[%s4941_s2 + $0x20] sm:$0xff]   ;;  %v3956_v24 = vld [vmem:[%s4941_s2 + $0x28] sm:$0xff]   ;;  %v3957_v25 = vld [vmem:[%s4941_s2 + $0x30] sm:$0xff]   ;;  %vm862_vm4 = vcmask 261120   ;;  %vm915_vm5 = vcmask 130048  }
  0x76   : > { %v441_v1 = vld [vmem:[%s427_s30] sm:$0x3]  ;;  %v3958_v26 = vld [vmem:[%s4941_s2 + $0x38] sm:$0xff]   ;;  %v481_v43 = vld [vmem:[%s4947_s8 + $0x68] sm:$0xff]  ;;  %s4107_s15 = smov 120   ;;  %s4109_s24 = smov 112  }
  0x77   : > { %3870 = vmatprep.subr.msk.bf16.mxu0 %vm580_vm0, %v441_v1  ;;  %v582_v2 = vsel %vm580_vm0, %v441_v1, 0  ;;  %v442_v6 = vld [vmem:[%s431_s25] sm:$0x3]  ;;  %vm448_vm2 = vcmp.eq.s32.totalorder %v447_v18, %v4366_v17  ;;  %s4110_s30 = smov 108   ;;  %s4111_s21 = smov 104   ;;  %v473_v45 = vld [vmem:[%s4947_s8 + $0x28] sm:$0xff] }
  0x78   : > { %3559 = vmatpush3.bf16.msra.mxu0 %v582_v2  ;;  %3871 = vmatprep.subr.msk.bf16.mxu1 %vm580_vm0, %v442_v6  ;;  %v702_v7 = vsel %vm580_vm0, %v442_v6, 0  ;;  %v449_v20 = vsel %vm448_vm2, 1.0, %v4105_v19  ;;  %v480_v44 = vld [vmem:[%s4947_s8 + $0x60] sm:$0xff]  ;;  %s4112_s19 = smov 100   ;;  %v475_v47 = vld [vmem:[%s4947_s8 + $0x38] sm:$0xff]  ;;  %v474_v48 = vld [vmem:[%s4947_s8 + $0x30] sm:$0xff] }
  0x79   : > { %3577 = vmatpush3.bf16.msra.mxu1 %v702_v7  ;;  %834 = vperm.xlu1 %3948, %v471_v13   ;;  %v4371_v21 = vpack.c.bf16 %v449_v20, %v449_v20  ;;  %v472_v46 = vld [vmem:[%s4947_s8 + $0x20] sm:$0xff]  ;;  %v483_v49 = vld [vmem:[%s4947_s8 + $0x78] sm:$0xff]  ;;  %v482_v50 = vld [vmem:[%s4947_s8 + $0x70] sm:$0xff]  ;;  %vm1125_vm6 = vcmp.lt.s32.totalorder %v4364_v16, 4  ;;  %vm1126_vm7 = vcmp.ge.s32.totalorder %v4364_v16, 8  ;;  %vm961_vm8 = vcmp.ge.s32.totalorder %v4364_v16, 4 }
  0x7a   : > { %824 = vperm.xlu0 %3947, %v469_v14   ;;  %v487_v51 = vld [vmem:[%s4947_s8 + $0x98] sm:$0x1f]  ;;  %v486_v52 = vld [vmem:[%s4947_s8 + $0x90] sm:$0x1f]  ;;  %v477_v53 = vld [vmem:[%s4947_s8 + $0x48] sm:$0xff]  ;;  %vm1288_vm10 = vcmp.lt.s32.totalorder %v4364_v16, 8 }
  0x7b   : > { %3561 = vmatmul.mubr.msk.bf16.vlgmr.msra.gmra.mrb[0].mxu0 %vm555_vm1, %v3950_v4  ;;  %3872 = vmatprep.subr.msk.bf16.mxu1 %vm580_vm0, %v4371_v21  ;;  %v4377_v22 = vsel %vm580_vm0, %v4371_v21, 0  ;;  %v476_v54 = vld [vmem:[%s4947_s8 + $0x40] sm:$0xff]  ;;  %v479_v55 = vld [vmem:[%s4947_s8 + $0x58] sm:$0xff]  ;;  %v478_v56 = vld [vmem:[%s4947_s8 + $0x50] sm:$0xff]  ;;  %vm1289_vm11 = vcmp.ge.s32.totalorder %v4364_v16, 12  ;;  %vm1451_vm13 = vcmp.lt.s32.totalorder %v4364_v16, 12 }
  0x7c   : > { %3564 = vmatprep.mubr.msk.bf16.mxu0 %vm555_vm1, %v3951_v5  ;;  %3579 = vmatmul.mubr.msk.bf16.vlgmr.msra.gmra.mrb[0].mxu1 %vm555_vm1, %v3954_v9  ;;  %v485_v57 = vld [vmem:[%s4947_s8 + $0x88] sm:$0xff]  ;;  %v484_v58 = vld [vmem:[%s4947_s8 + $0x80] sm:$0xff]  ;;  %vm1127_vm9 = vmor %vm1125_vm6, %vm1126_vm7  ;;  %vm1452_vm14 = vcmp.ge.s32.totalorder %v4364_v16, 16  ;;  %vm1614_vm2 = vcmp.lt.s32.totalorder %v4364_v16, 16  ;;  %vm1615_vm6 = vcmp.ge.s32.totalorder %v4364_v16, 20  ;;  %s3344_s27 = sshll.u32 %s4963_s14, 3 }
  0x7d   : > { %3873 = vmatprep.subr.msk.bf16.mxu0 %vm580_vm0, %v4371_v21  ;;  %3583 = vmatpush3.bf16.msra.mxu1 %v4377_v22  ;;  %v489_v59 = vld [vmem:[%s4947_s8 + $0xa8] sm:$0x7]  ;;  %v488_v60 = vld [vmem:[%s4947_s8 + $0xa0] sm:$0x3f]  ;;  %vm1290_vm12 = vmor %vm1288_vm10, %vm1289_vm11  ;;  %vm1940_vm11 = vcmp.lt.s32.totalorder %v4364_v16, 24  ;;  %s439_s12 = scalar_lea.vmem %s4949_s10, %s3344_s27  ;;  %s3343_s16 = sshll.u32 %s4963_s14, 2 }
  0x7e   : > { %3603 = vmatpush3.bf16.msra.mxu0 %v4377_v22  ;;  %3588 = vmatprep.subr.bf16.mxu1 %v4105_v19  ;;  %vm1453_vm15 = vmor %vm1451_vm13, %vm1452_vm14  ;;  %vm2103_vm14 = vcmp.lt.s32.totalorder %v4364_v16, 28 }
  0x7f   : > { %3616 = vmatprep.subr.bf16.mxu0 %v4105_v19  ;;  %vm1616_vm7 = vmor %vm1614_vm2, %vm1615_vm6 }
  0x83   : > { %3565 = vmatmul.mubr.msk.bf16.gmra.mrb[4].mxu0 %vm555_vm1, %v3952_v11 }
  0x84   : > { %3568 = vmatprep.mubr.msk.bf16.mxu0 %vm555_vm1, %v3955_v23 }
  0x8b   : > { %3569 = vmatmul.mubr.msk.bf16.gmra.mrb[8].mxu0 %vm555_vm1, %v3956_v24 }
  0x8c   : > { %3572 = vmatprep.mubr.msk.bf16.mxu0 %vm555_vm1, %v3957_v25 }
  0x93   : > { %3573 = vmatmul.mubr.msk.bf16.gmra.mrb[12].mxu0 %vm555_vm1, %v3958_v26 }
  0xf3   : > { %v4491_v62 = vpop.permute.xlu1 %829 }
  0xf4   : > { %v4489_v61 = vpop.permute.xlu0 %819 }
  0xf8   : > { %v4495_v0 = vpop.permute.xlu1 %834 }
  0xf9   : > { %v4493_v63 = vpop.permute.xlu0 %824 }
 0x14e   : > { %v4401_v27 = vpop.f32.mrb[0].mxu0 }
 0x14f   : > { %v4403_v28 = vpop.f32.mrb[1].mxu0  ;;  %v3580_v31 = vpop.f32.mrb[0].mxu1 }
 0x150   : > { %v4405_v29 = vpop.f32.mrb[2].mxu0  ;;  %v738_v32 = vpop.f32.mrb[1].mxu1 }
 0x151   : > { %v4407_v30 = vpop.f32.mrb[3].mxu0  ;;  %v3581_v33 = vpop.f32.mrb[2].mxu1 }
 0x152   : > { %v4409_v34 = vpack.c.bf16 %v3581_v33, %v3580_v31  ;;  %v741_v35 = vpop.f32.mrb[3].mxu1 }
 0x153   : > { %v4411_v37 = vpack.c.bf16 %v741_v35, %v738_v32  ;;  %v4518_v35 = vld [vmem:[#allocation4] sm:$0xff]  }
 0x156   : > { %v3566_v36 = vpop.f32.mrb[4].mxu0 }
 0x157   : > { %v634_v38 = vpop.f32.mrb[5].mxu0 }
 0x158   : > { %v3567_v39 = vpop.f32.mrb[6].mxu0 }
 0x159   : > { %v754_v40 = vpack.c.bf16 %v3567_v39, %v3566_v36  ;;  %v637_v41 = vpop.f32.mrb[7].mxu0 }
 0x15a   : > { %v753_v42 = vpack.c.bf16 %v637_v41, %v634_v38 }
 0x15b   : > { %969 = vrot.lane.b32.xlu1 %v754_v40, %s4106_s11 }
 0x15c   : > { %967 = vrot.lane.b32.xlu0 %v753_v42, %s4106_s11  ;;  %3584 = vmatprep.mubr.msk.bf16.mxu1 %vm555_vm1, %v753_v42 }
 0x15d   : > { %3585 = vmatmul.mubr.msk.bf16.vlgmr.msra.gmra.mrb[4].mxu1 %vm555_vm1, %v754_v40 }
 0x15e   : > { %3592 = vmatprep.mubr.msk.bf16.mxu1 %vm4113_vm3, %v4105_v19  ;;  %v4501_v3 = vpop.f32.mrb[8].mxu0 }
 0x15f   : > { %854 = vperm.xlu1 %3948, %v481_v43   ;;  %v4503_v4 = vpop.f32.mrb[9].mxu0 }
 0x160   : > { %849 = vperm.xlu0 %3947, %v480_v44   ;;  %v4505_v5 = vpop.f32.mrb[10].mxu0 }
 0x161   : > { %v4507_v6 = vpop.f32.mrb[11].mxu0 }
 0x163   : > { %1132 = vrot.lane.b32.xlu1 %v754_v40, %s4107_s15 }
 0x164   : > { %1130 = vrot.lane.b32.xlu0 %v753_v42, %s4107_s15 }
 0x167   : > { %1295 = vrot.lane.b32.xlu1 %v754_v40, %s4108_s20 }
 0x168   : > { %1293 = vrot.lane.b32.xlu0 %v753_v42, %s4108_s20 }
 0x16b   : > { %1458 = vrot.lane.b32.xlu1 %v754_v40, %s4109_s24 }
 0x16c   : > { %1456 = vrot.lane.b32.xlu0 %v753_v42, %s4109_s24  ;;  %s435_s24 = scalar_lea.vmem %s4948_s9, %s3343_s16 }
 0x16f   : > { %1621 = vrot.lane.b32.xlu1 %v754_v40, %s4110_s30 }
 0x170   : > { %1619 = vrot.lane.b32.xlu0 %v753_v42, %s4110_s30 }
 0x173   : > { %1784 = vrot.lane.b32.xlu1 %v754_v40, %s4111_s21 }
 0x174   : > { %1782 = vrot.lane.b32.xlu0 %v753_v42, %s4111_s21 }
 0x177   : > { %1947 = vrot.lane.b32.xlu1 %v754_v40, %s4112_s19 }
 0x178   : > { %1945 = vrot.lane.b32.xlu0 %v753_v42, %s4112_s19 }
 0x17b   : > { %2176 = vperm.xlu1 %3948, %v473_v45  }
 0x17c   : > { %2171 = vperm.xlu0 %3947, %v472_v46  }
 0x17f   : > { %2186 = vperm.xlu1 %3948, %v475_v47  }
 0x180   : > { %2181 = vperm.xlu0 %3947, %v474_v48  }
 0x183   : > { %2315 = vrot.lane.b32.xlu1 %v4409_v34, %s4106_s11 }
 0x184   : > { %2313 = vrot.lane.b32.xlu0 %v4411_v37, %s4106_s11 }
 0x187   : > { %2206 = vperm.xlu1 %3948, %v483_v49  }
 0x188   : > { %2201 = vperm.xlu0 %3947, %v482_v50  }
 0x18b   : > { %2474 = vrot.lane.b32.xlu1 %v4409_v34, %s4107_s15 }
 0x18c   : > { %2472 = vrot.lane.b32.xlu0 %v4411_v37, %s4107_s15 }
 0x18f   : > { %2633 = vrot.lane.b32.xlu1 %v4409_v34, %s4108_s20 }
 0x190   : > { %2631 = vrot.lane.b32.xlu0 %v4411_v37, %s4108_s20 }
 0x193   : > { %2263 = vperm.xlu1 %3948, %v487_v51  }
 0x194   : > { %912 = vperm.xlu0 %3947, %v486_v52  }
 0x197   : > { %2955 = vperm.xlu1 %3948, %v477_v53  }
 0x198   : > { %2950 = vperm.xlu0 %3947, %v476_v54  }
 0x19b   : > { %2965 = vperm.xlu1 %3948, %v479_v55  }
 0x19c   : > { %2960 = vperm.xlu0 %3947, %v478_v56  }
 0x19f   : > { %2985 = vperm.xlu1 %3948, %v485_v57  }
 0x1a0   : > { %2980 = vperm.xlu0 %3947, %v484_v58  }
 0x1a3   : > { %3137 = vperm.xlu1 %3948, %v489_v59  }
 0x1a4   : > { %3042 = vperm.xlu0 %3947, %v488_v60  }
 0x1cd   : > { %v970_v2 = vpop.permute.xlu1 %969 }
 0x1ce   : > { %v968_v1 = vpop.permute.xlu0 %967 }
 0x1cf   : > { %3604 = vmatprep.mubr.msk.bf16.mxu0 %vm555_vm1, %v968_v1 }
 0x1d0   : > { %3605 = vmatmul.mubr.msk.bf16.vlgmr.msra.gmra.mrb[16].mxu0 %vm555_vm1, %v970_v2 }
 0x1d1   : > { %3618 = vmatprep.mubr.msk.bf16.mxu0 %vm4113_vm3, %v4105_v19 }
 0x1de   : > { %v4536_v59 = vpop.permute.xlu1 %854 }
 0x1df   : > { %v4533_v55 = vpop.permute.xlu0 %849 }
 0x230   : > { %v3586_v7 = vpop.f32.mrb[4].mxu1 }
 0x231   : > { %v815_v8 = vadd.f32 %v3586_v7, %v4401_v27  ;;  %v798_v9 = vpop.f32.mrb[5].mxu1 }
 0x232   : > { %v813_v10 = vadd.f32 %v798_v9, %v4403_v28  ;;  %v3587_v11 = vpop.f32.mrb[6].mxu1 }
 0x233   : > { %v839_v12 = vadd.f32 %v4491_v62, %v815_v8  ;;  %v816_v13 = vadd.f32 %v3587_v11, %v4405_v29  ;;  %v801_v14 = vpop.f32.mrb[7].mxu1  ;;  %v1131_v11 = vpop.permute.xlu0 %1130 }
 0x234   : > { %v837_v15 = vadd.f32 %v4489_v61, %v813_v10  ;;  %v814_v18 = vadd.f32 %v801_v14, %v4407_v30  ;;  %v4539_v10 = vld [vmem:[#allocation6] sm:$0x7] }
 0x235   : > { %v840_v20 = vadd.f32 %v4495_v0, %v816_v13  ;;  %v843_v24 = vmax.f32 %v839_v12, 0.0  ;;  %v1133_v12 = vpop.permute.xlu1 %1132 }
 0x236   : > { %v838_v23 = vadd.f32 %v4493_v63, %v814_v18  ;;  %v841_v26 = vmax.f32 %v837_v15, 0.0 }
 0x237   : > { %v844_v25 = vmax.f32 %v840_v20, 0.0 }
 0x238   : > { %v842_v31 = vmax.f32 %v838_v23, 0.0 }
 0x239   : > { %v846_v32 = vpack.c.bf16 %v844_v25, %v843_v24 }
 0x23a   : > { %v845_v33 = vpack.c.bf16 %v842_v31, %v841_v26 }
 0x23c   : > { %3589 = vmatpush3.bf16.msra.mxu1 %v845_v33 }
 0x23d   : > { %3590 = vmatprep.subr.bf16.mxu1 %v4105_v19 }
 0x240   : > { %3591 = vmatpush3.bf16.msra.mxu1 %v846_v32 }
 0x241   : > { %3596 = vmatprep.subr.bf16.mxu1 %v4105_v19 }
 0x243   : > { %3593 = vmatmul.mubr.msk.bf16.vlgmr.msra.gmra.mrb[8].mxu1 %vm862_vm4, %v4518_v35 }
 0x244   : > { %3598 = vmatprep.mubr.msk.bf16.mxu1 %vm4113_vm3, %v4105_v19 }
 0x2a3   : > { %v3606_v36 = vpop.f32.mrb[16].mxu0 }
 0x2a4   : > { %v1028_v38 = vadd.f32 %v3606_v36, %v4401_v27  ;;  %v1011_v39 = vpop.f32.mrb[17].mxu0 }
 0x2a5   : > { %v1026_v40 = vadd.f32 %v1011_v39, %v4403_v28  ;;  %v3607_v41 = vpop.f32.mrb[18].mxu0 }
 0x2a6   : > { %v1032_v42 = vadd.f32 %v1028_v38, %v4491_v62  ;;  %v1029_v43 = vadd.f32 %v3607_v41, %v4405_v29  ;;  %v1014_v44 = vpop.f32.mrb[19].mxu0 }
 0x2a7   : > { %v1030_v45 = vadd.f32 %v1026_v40, %v4489_v61  ;;  %v1027_v46 = vadd.f32 %v1014_v44, %v4407_v30 }
 0x2a8   : > { %v1033_v47 = vadd.f32 %v1029_v43, %v4495_v0  ;;  %v1036_v49 = vmax.f32 %v1032_v42, 0.0 }
 0x2a9   : > { %v1031_v48 = vadd.f32 %v1027_v46, %v4493_v63  ;;  %v1034_v51 = vmax.f32 %v1030_v45, 0.0 }
 0x2aa   : > { %v1037_v50 = vmax.f32 %v1033_v47, 0.0 }
 0x2ab   : > { %v1035_v52 = vmax.f32 %v1031_v48, 0.0 }
 0x2ac   : > { %v1039_v53 = vpack.c.bf16 %v1037_v50, %v1036_v49 }
 0x2ad   : > { %v1038_v54 = vpack.c.bf16 %v1035_v52, %v1034_v51 }
 0x316   : > { %v900_v56 = vpop.f32.mrb[8].mxu1 }
 0x317   : > { %v901_v57 = vadd.f32 %v900_v56, %v4533_v55  ;;  %v3594_v58 = vpop.f32.mrb[9].mxu1 }
 0x318   : > { %v903_v60 = vpop.f32.mrb[10].mxu1  ;;  %v1296_v58 = vpop.permute.xlu1 %1295 }
 0x319   : > { %v904_v1 = vadd.f32 %v903_v60, %v4536_v59  ;;  %v3595_v2 = vpop.f32.mrb[11].mxu1  ;;  %v907_v7 = vmax.f32 %v901_v57, 0.0  ;;  %v1294_v57 = vpop.permute.xlu0 %1293 }
 0x31b   : > { %v908_v8 = vmax.f32 %v904_v1, 0.0 }
 0x31d   : > { %v909_v9 = vpack.c.bf16 %v908_v8, %v907_v7  ;;  %v1457_v60 = vpop.permute.xlu0 %1456 }
 0x31f   : > { %3597 = vmatpush3.bf16.msra.mxu1 %v909_v9 }
 0x320   : > { %3608 = vmatprep.subr.bf16.mxu1 %v4105_v19 }
 0x321   : > { %v4583_v1 = vpop.permute.xlu0 %1619 }
 0x322   : > { %3599 = vmatmul.mubr.msk.bf16.vlgmr.msra.gmra.mrb[12].mxu1 %vm915_vm5, %v4539_v10 }
 0x323   : > { %3609 = vmatpush3.bf16.msra.mxu1 %v1038_v54  ;;  %3612 = vmatprep.mubr.msk.bf16.mxu1 %vm4113_vm3, %v4105_v19 }
 0x324   : > { %3610 = vmatprep.subr.bf16.mxu1 %v4105_v19 }
 0x325   : > { %v4585_v2 = vpop.permute.xlu0 %1782 }
 0x327   : > { %3611 = vmatpush3.bf16.msra.mxu1 %v1039_v53 }
 0x328   : > { %3874 = vmatprep.subr.msk.bf16.mxu1 %vm580_vm0, %v4371_v21 }
 0x329   : > { %v4587_v7 = vpop.permute.xlu0 %1945 }
 0x32a   : > { %3613 = vmatmul.mubr.msk.bf16.vlgmr.msra.gmra.mrb[16].mxu1 %vm862_vm4, %v4518_v35 }
 0x32b   : > { %3624 = vmatprep.mubr.msk.bf16.mxu1 %vm555_vm1, %v1131_v11  ;;  %3623 = vmatpush3.bf16.msra.mxu1 %v4377_v22 }
 0x32c   : > { %3636 = vmatprep.subr.bf16.mxu1 %v4105_v19 }
 0x32d   : > { %v4589_v8 = vpop.permute.xlu0 %2171 }
 0x331   : > { %v4591_v9 = vpop.permute.xlu0 %2181 }
 0x332   : > { %3625 = vmatmul.mubr.msk.bf16.vlgmr.msra.gmra.mrb[20].mxu1 %vm555_vm1, %v1133_v12 }
 0x333   : > { %3638 = vmatprep.mubr.msk.bf16.mxu1 %vm4113_vm3, %v4105_v19 }
 0x335   : > { %v4593_v11 = vpop.permute.xlu0 %2313 }
 0x339   : > { %v4595_v12 = vpop.permute.xlu0 %2201 }
 0x3f5   : > { %v953_v13 = vpop.f32.mrb[12].mxu1 }
 0x3f6   : > { %v3600_v14 = vpop.f32.mrb[13].mxu1 }
 0x3f7   : > { %v956_v15 = vpop.f32.mrb[14].mxu1  ;;  %v4597_v14 = vpop.permute.xlu0 %2472 }
 0x3f8   : > { %v3601_v18 = vpop.f32.mrb[15].mxu1 }
 0x3fb   : > { %v4599_v15 = vpop.permute.xlu0 %2631 }
 0x3fd   : > { %v1074_v20 = vpop.f32.mrb[16].mxu1 }
 0x3fe   : > { %v1075_v23 = vadd.f32 %v1074_v20, %v4533_v55  ;;  %v3614_v24 = vpop.f32.mrb[17].mxu1 }
 0x3ff   : > { %v1077_v25 = vpop.f32.mrb[18].mxu1  ;;  %v4601_v18 = vpop.permute.xlu0 %912 }
 0x400   : > { %v1078_v26 = vadd.f32 %v1077_v25, %v4536_v59  ;;  %v3615_v31 = vpop.f32.mrb[19].mxu1  ;;  %v1081_v32 = vmax.f32 %v1075_v23, 0.0  ;;  %v954_v20 = vadd.f32 %v953_v13, %v4601_v18 }
 0x402   : > { %v1082_v33 = vmax.f32 %v1078_v26, 0.0  ;;  %v959_v24 = vmax.f32 %v954_v20, 0.0 }
 0x404   : > { %v1083_v36 = vpack.c.bf16 %v1082_v33, %v1081_v32 }
 0x405   : > { %v3626_v38 = vpop.f32.mrb[20].mxu1 }
 0x406   : > { %v1191_v39 = vadd.f32 %v3626_v38, %v4401_v27  ;;  %3617 = vmatpush3.bf16.msra.mxu0 %v1083_v36  ;;  %v1174_v40 = vpop.f32.mrb[21].mxu1  ;;  %v963_v36 = vsel %vm961_vm8, %v959_v24, 0.0  ;;  %vm1777_vm8 = vcmp.lt.s32.totalorder %v4364_v16, 20 }
 0x407   : > { %v1189_v41 = vadd.f32 %v1174_v40, %v4403_v28  ;;  %v3627_v42 = vpop.f32.mrb[22].mxu1  ;;  %3628 = vmatprep.subr.bf16.mxu0 %v4105_v19 }
 0x408   : > { %v1195_v43 = vadd.f32 %v1191_v39, %v4491_v62  ;;  %v1192_v44 = vadd.f32 %v3627_v42, %v4405_v29  ;;  %v1177_v45 = vpop.f32.mrb[23].mxu1 }
 0x409   : > { %v1193_v46 = vadd.f32 %v1189_v41, %v4489_v61  ;;  %v1190_v47 = vadd.f32 %v1177_v45, %v4407_v30  ;;  %3619 = vmatmul.mubr.msk.bf16.vlgmr.msra.gmra.mrb[20].mxu0 %vm915_vm5, %v4539_v10 }
 0x40a   : > { %v1196_v48 = vadd.f32 %v1192_v44, %v4495_v0  ;;  %3632 = vmatprep.mubr.msk.bf16.mxu0 %vm4113_vm3, %v4105_v19  ;;  %v1199_v50 = vmax.f32 %v1195_v43, 0.0 }
 0x40b   : > { %v1194_v49 = vadd.f32 %v1190_v47, %v4493_v63  ;;  %v1197_v52 = vmax.f32 %v1193_v46, 0.0 }
 0x40c   : > { %v1200_v51 = vmax.f32 %v1196_v48, 0.0 }
 0x40d   : > { %v1198_v53 = vmax.f32 %v1194_v49, 0.0 }
 0x40e   : > { %v1202_v54 = vpack.c.bf16 %v1200_v51, %v1199_v50 }
 0x40f   : > { %v1201_v56 = vpack.c.bf16 %v1198_v53, %v1197_v52 }
 0x411   : > { %3629 = vmatpush3.bf16.msra.mxu0 %v1201_v56 }
 0x412   : > { %3630 = vmatprep.subr.bf16.mxu0 %v4105_v19 }
 0x415   : > { %3631 = vmatpush3.bf16.msra.mxu0 %v1202_v54 }
 0x416   : > { %3875 = vmatprep.subr.msk.bf16.mxu0 %vm580_vm0, %v4371_v21 }
 0x418   : > { %3633 = vmatmul.mubr.msk.bf16.vlgmr.msra.gmra.mrb[24].mxu0 %vm862_vm4, %v4518_v35 }
 0x419   : > { %3644 = vmatprep.mubr.msk.bf16.mxu0 %vm555_vm1, %v1294_v57  ;;  %3643 = vmatpush3.bf16.msra.mxu0 %v4377_v22 }
 0x41a   : > { %3656 = vmatprep.subr.bf16.mxu0 %v4105_v19 }
 0x420   : > { %3645 = vmatmul.mubr.msk.bf16.vlgmr.msra.gmra.mrb[28].mxu0 %vm555_vm1, %v1296_v58 }
 0x421   : > { %3658 = vmatprep.mubr.msk.bf16.mxu0 %vm4113_vm3, %v4105_v19 }
 0x4dc   : > { %v1118_v23 = vpop.f32.mrb[20].mxu0 }
 0x4dd   : > { %v1119_v25 = vadd.f32 %v1118_v23, %v4601_v18  ;;  %v3620_v26 = vpop.f32.mrb[21].mxu0 }
 0x4de   : > { %v1121_v31 = vpop.f32.mrb[22].mxu0 }
 0x4df   : > { %v1124_v32 = vmax.f32 %v1119_v25, 0.0  ;;  %v3621_v33 = vpop.f32.mrb[23].mxu0 }
 0x4e1   : > { %v1128_v38 = vsel %vm1127_vm9, %v1124_v32, 0.0  ;;  %vm1778_vm9 = vcmp.ge.s32.totalorder %v4364_v16, 24 }
 0x4e2   : > { %v1129_v39 = vadd.f32 %v1128_v38, %v963_v36  ;;  %v1459_v36 = vpop.permute.xlu1 %1458  ;;  %vm1779_vm10 = vmor %vm1777_vm8, %vm1778_vm9 }
 0x4eb   : > { %v1237_v40 = vpop.f32.mrb[24].mxu0 }
 0x4ec   : > { %v1238_v13 = vadd.f32 %v1237_v40, %v4533_v55  ;;  %v3634_v41 = vpop.f32.mrb[25].mxu0 }
 0x4ed   : > { %v1240_v42 = vpop.f32.mrb[26].mxu0 }
 0x4ee   : > { %v1241_v43 = vadd.f32 %v1240_v42, %v4536_v59  ;;  %v3635_v44 = vpop.f32.mrb[27].mxu0  ;;  %v1244_v45 = vmax.f32 %v1238_v13, 0.0 }
 0x4f0   : > { %v1245_v46 = vmax.f32 %v1241_v43, 0.0 }
 0x4f2   : > { %v1246_v47 = vpack.c.bf16 %v1245_v46, %v1244_v45 }
 0x4f3   : > { %v3646_v48 = vpop.f32.mrb[28].mxu0 }
 0x4f4   : > { %v1354_v49 = vadd.f32 %v3646_v48, %v4401_v27  ;;  %3637 = vmatpush3.bf16.msra.mxu1 %v1246_v47  ;;  %v1337_v50 = vpop.f32.mrb[29].mxu0 }
 0x4f5   : > { %v1352_v51 = vadd.f32 %v1337_v50, %v4403_v28  ;;  %v3647_v52 = vpop.f32.mrb[30].mxu0  ;;  %3648 = vmatprep.subr.bf16.mxu1 %v4105_v19 }
 0x4f6   : > { %v1358_v53 = vadd.f32 %v1354_v49, %v4491_v62  ;;  %v1355_v54 = vadd.f32 %v3647_v52, %v4405_v29  ;;  %v1340_v56 = vpop.f32.mrb[31].mxu0 }
 0x4f7   : > { %v1356_v57 = vadd.f32 %v1352_v51, %v4489_v61  ;;  %v1353_v58 = vadd.f32 %v1340_v56, %v4407_v30  ;;  %3639 = vmatmul.mubr.msk.bf16.vlgmr.msra.gmra.mrb[24].mxu1 %vm915_vm5, %v4539_v10 }
 0x4f8   : > { %v1359_v20 = vadd.f32 %v1355_v54, %v4495_v0  ;;  %3652 = vmatprep.mubr.msk.bf16.mxu1 %vm4113_vm3, %v4105_v19  ;;  %v1362_v24 = vmax.f32 %v1358_v53, 0.0 }
 0x4f9   : > { %v1357_v23 = vadd.f32 %v1353_v58, %v4493_v63  ;;  %v1360_v26 = vmax.f32 %v1356_v57, 0.0 }
 0x4fa   : > { %v1363_v25 = vmax.f32 %v1359_v20, 0.0 }
 0x4fb   : > { %v1361_v31 = vmax.f32 %v1357_v23, 0.0 }
 0x4fc   : > { %v1365_v32 = vpack.c.bf16 %v1363_v25, %v1362_v24 }
 0x4fd   : > { %v1364_v33 = vpack.c.bf16 %v1361_v31, %v1360_v26 }
 0x4ff   : > { %3649 = vmatpush3.bf16.msra.mxu1 %v1364_v33 }
 0x500   : > { %3650 = vmatprep.subr.bf16.mxu1 %v4105_v19 }
 0x503   : > { %3651 = vmatpush3.bf16.msra.mxu1 %v1365_v32 }
 0x504   : > { %3876 = vmatprep.subr.msk.bf16.mxu1 %vm580_vm0, %v4371_v21 }
 0x506   : > { %3653 = vmatmul.mubr.msk.bf16.vlgmr.msra.gmra.mrb[28].mxu1 %vm862_vm4, %v4518_v35 }
 0x507   : > { %3664 = vmatprep.mubr.msk.bf16.mxu1 %vm555_vm1, %v1457_v60  ;;  %3663 = vmatpush3.bf16.msra.mxu1 %v4377_v22 }
 0x508   : > { %3676 = vmatprep.subr.bf16.mxu1 %v4105_v19 }
 0x50e   : > { %3665 = vmatmul.mubr.msk.bf16.vlgmr.msra.gmra.mrb[32].mxu1 %vm555_vm1, %v1459_v36 }
 0x50f   : > { %3678 = vmatprep.mubr.msk.bf16.mxu1 %vm4113_vm3, %v4105_v19 }
 0x5ca   : > { %v1281_v38 = vpop.f32.mrb[24].mxu1 }
 0x5cb   : > { %v1282_v40 = vadd.f32 %v1281_v38, %v4601_v18  ;;  %v3640_v13 = vpop.f32.mrb[25].mxu1 }
 0x5cc   : > { %v1284_v60 = vpop.f32.mrb[26].mxu1 }
 0x5cd   : > { %v1287_v41 = vmax.f32 %v1282_v40, 0.0  ;;  %v3641_v42 = vpop.f32.mrb[27].mxu1 }
 0x5cf   : > { %v1291_v43 = vsel %vm1290_vm12, %v1287_v41, 0.0  ;;  %v1622_v41 = vpop.permute.xlu1 %1621  ;;  %vm1941_vm12 = vcmp.ge.s32.totalorder %v4364_v16, 28 }
 0x5d0   : > { %v1292_v44 = vadd.f32 %v1291_v43, %v1129_v39  ;;  %vm1942_vm13 = vmor %vm1940_vm11, %vm1941_vm12  ;;  %vm3140_vm11 = vcmask 48128  }
 0x5d9   : > { %v1400_v45 = vpop.f32.mrb[28].mxu1 }
 0x5da   : > { %v1401_v46 = vadd.f32 %v1400_v45, %v4533_v55  ;;  %v3654_v47 = vpop.f32.mrb[29].mxu1 }
 0x5db   : > { %v1403_v48 = vpop.f32.mrb[30].mxu1 }
 0x5dc   : > { %v1404_v49 = vadd.f32 %v1403_v48, %v4536_v59  ;;  %v3655_v50 = vpop.f32.mrb[31].mxu1  ;;  %v1407_v51 = vmax.f32 %v1401_v46, 0.0 }
 0x5de   : > { %v1408_v52 = vmax.f32 %v1404_v49, 0.0 }
 0x5e0   : > { %v1409_v53 = vpack.c.bf16 %v1408_v52, %v1407_v51 }
 0x5e1   : > { %v3666_v54 = vpop.f32.mrb[32].mxu1 }
 0x5e2   : > { %v1517_v56 = vadd.f32 %v3666_v54, %v4401_v27  ;;  %3657 = vmatpush3.bf16.msra.mxu0 %v1409_v53  ;;  %v1500_v57 = vpop.f32.mrb[33].mxu1 }
 0x5e3   : > { %v1515_v58 = vadd.f32 %v1500_v57, %v4403_v28  ;;  %v3667_v20 = vpop.f32.mrb[34].mxu1  ;;  %3668 = vmatprep.subr.bf16.mxu0 %v4105_v19 }
 0x5e4   : > { %v1521_v39 = vadd.f32 %v1517_v56, %v4491_v62  ;;  %v1518_v23 = vadd.f32 %v3667_v20, %v4405_v29  ;;  %v1503_v24 = vpop.f32.mrb[35].mxu1 }
 0x5e5   : > { %v1519_v25 = vadd.f32 %v1515_v58, %v4489_v61  ;;  %v1516_v26 = vadd.f32 %v1503_v24, %v4407_v30  ;;  %3659 = vmatmul.mubr.msk.bf16.vlgmr.msra.gmra.mrb[32].mxu0 %vm915_vm5, %v4539_v10 }
 0x5e6   : > { %v1522_v31 = vadd.f32 %v1518_v23, %v4495_v0  ;;  %3672 = vmatprep.mubr.msk.bf16.mxu0 %vm4113_vm3, %v4105_v19  ;;  %v1525_v33 = vmax.f32 %v1521_v39, 0.0 }
 0x5e7   : > { %v1520_v32 = vadd.f32 %v1516_v26, %v4493_v63  ;;  %v1523_v38 = vmax.f32 %v1519_v25, 0.0 }
 0x5e8   : > { %v1526_v36 = vmax.f32 %v1522_v31, 0.0 }
 0x5e9   : > { %v1524_v40 = vmax.f32 %v1520_v32, 0.0 }
 0x5ea   : > { %v1528_v13 = vpack.c.bf16 %v1526_v36, %v1525_v33 }
 0x5eb   : > { %v1527_v60 = vpack.c.bf16 %v1524_v40, %v1523_v38 }
 0x5ed   : > { %3669 = vmatpush3.bf16.msra.mxu0 %v1527_v60 }
 0x5ee   : > { %3670 = vmatprep.subr.bf16.mxu0 %v4105_v19 }
 0x5f1   : > { %3671 = vmatpush3.bf16.msra.mxu0 %v1528_v13 }
 0x5f2   : > { %3877 = vmatprep.subr.msk.bf16.mxu0 %vm580_vm0, %v4371_v21 }
 0x5f4   : > { %3673 = vmatmul.mubr.msk.bf16.vlgmr.msra.gmra.mrb[36].mxu0 %vm862_vm4, %v4518_v35 }
 0x5f5   : > { %3684 = vmatprep.mubr.msk.bf16.mxu0 %vm555_vm1, %v4583_v1  ;;  %3683 = vmatpush3.bf16.msra.mxu0 %v4377_v22 }
 0x5f6   : > { %3696 = vmatprep.subr.bf16.mxu0 %v4105_v19 }
 0x5fc   : > { %3685 = vmatmul.mubr.msk.bf16.vlgmr.msra.gmra.mrb[40].mxu0 %vm555_vm1, %v1622_v41 }
 0x5fd   : > { %3698 = vmatprep.mubr.msk.bf16.mxu0 %vm4113_vm3, %v4105_v19 }
 0x6b8   : > { %v1444_v42 = vpop.f32.mrb[32].mxu0 }
 0x6b9   : > { %v1445_v43 = vadd.f32 %v1444_v42, %v4601_v18  ;;  %v3660_v45 = vpop.f32.mrb[33].mxu0 }
 0x6ba   : > { %v1447_v1 = vpop.f32.mrb[34].mxu0 }
 0x6bb   : > { %v1450_v46 = vmax.f32 %v1445_v43, 0.0  ;;  %v3661_v47 = vpop.f32.mrb[35].mxu0  ;;  %v1785_v1 = vpop.permute.xlu1 %1784 }
 0x6bd   : > { %v1454_v48 = vsel %vm1453_vm15, %v1450_v46, 0.0  ;;  %vm2104_vm15 = vcmp.ge.s32.totalorder %v4364_v16, 32 }
 0x6be   : > { %v1455_v49 = vadd.f32 %v1454_v48, %v1292_v44  ;;  %vm2105_vm2 = vmor %vm2103_vm14, %vm2104_vm15 }
 0x6c7   : > { %v1563_v50 = vpop.f32.mrb[36].mxu0 }
 0x6c8   : > { %v1564_v51 = vadd.f32 %v1563_v50, %v4533_v55  ;;  %v3674_v52 = vpop.f32.mrb[37].mxu0 }
 0x6c9   : > { %v1566_v53 = vpop.f32.mrb[38].mxu0 }
 0x6ca   : > { %v1567_v54 = vadd.f32 %v1566_v53, %v4536_v59  ;;  %v3675_v56 = vpop.f32.mrb[39].mxu0  ;;  %v1570_v57 = vmax.f32 %v1564_v51, 0.0 }
 0x6cc   : > { %v1571_v58 = vmax.f32 %v1567_v54, 0.0 }
 0x6ce   : > { %v1572_v20 = vpack.c.bf16 %v1571_v58, %v1570_v57 }
 0x6cf   : > { %v3686_v39 = vpop.f32.mrb[40].mxu0 }
 0x6d0   : > { %v1680_v23 = vadd.f32 %v3686_v39, %v4401_v27  ;;  %3677 = vmatpush3.bf16.msra.mxu1 %v1572_v20  ;;  %v1663_v24 = vpop.f32.mrb[41].mxu0 }
 0x6d1   : > { %v1678_v25 = vadd.f32 %v1663_v24, %v4403_v28  ;;  %v3687_v26 = vpop.f32.mrb[42].mxu0  ;;  %3688 = vmatprep.subr.bf16.mxu1 %v4105_v19 }
 0x6d2   : > { %v1684_v44 = vadd.f32 %v1680_v23, %v4491_v62  ;;  %v1681_v31 = vadd.f32 %v3687_v26, %v4405_v29  ;;  %v1666_v32 = vpop.f32.mrb[43].mxu0 }
 0x6d3   : > { %v1682_v33 = vadd.f32 %v1678_v25, %v4489_v61  ;;  %v1679_v36 = vadd.f32 %v1666_v32, %v4407_v30  ;;  %3679 = vmatmul.mubr.msk.bf16.vlgmr.msra.gmra.mrb[36].mxu1 %vm915_vm5, %v4539_v10 }
 0x6d4   : > { %v1685_v38 = vadd.f32 %v1681_v31, %v4495_v0  ;;  %3692 = vmatprep.mubr.msk.bf16.mxu1 %vm4113_vm3, %v4105_v19  ;;  %v1688_v13 = vmax.f32 %v1684_v44, 0.0 }
 0x6d5   : > { %v1683_v40 = vadd.f32 %v1679_v36, %v4493_v63  ;;  %v1686_v41 = vmax.f32 %v1682_v33, 0.0 }
 0x6d6   : > { %v1689_v60 = vmax.f32 %v1685_v38, 0.0 }
 0x6d7   : > { %v1687_v42 = vmax.f32 %v1683_v40, 0.0 }
 0x6d8   : > { %v1691_v43 = vpack.c.bf16 %v1689_v60, %v1688_v13 }
 0x6d9   : > { %v1690_v45 = vpack.c.bf16 %v1687_v42, %v1686_v41 }
 0x6db   : > { %3689 = vmatpush3.bf16.msra.mxu1 %v1690_v45 }
 0x6dc   : > { %3690 = vmatprep.subr.bf16.mxu1 %v4105_v19 }
 0x6df   : > { %3691 = vmatpush3.bf16.msra.mxu1 %v1691_v43 }
 0x6e0   : > { %3878 = vmatprep.subr.msk.bf16.mxu1 %vm580_vm0, %v4371_v21 }
 0x6e2   : > { %3693 = vmatmul.mubr.msk.bf16.vlgmr.msra.gmra.mrb[40].mxu1 %vm862_vm4, %v4518_v35 }
 0x6e3   : > { %3704 = vmatprep.mubr.msk.bf16.mxu1 %vm555_vm1, %v4585_v2  ;;  %3703 = vmatpush3.bf16.msra.mxu1 %v4377_v22 }
 0x6e4   : > { %3716 = vmatprep.subr.bf16.mxu1 %v4105_v19 }
 0x6ea   : > { %3705 = vmatmul.mubr.msk.bf16.vlgmr.msra.gmra.mrb[44].mxu1 %vm555_vm1, %v1785_v1 }
 0x6eb   : > { %3718 = vmatprep.mubr.msk.bf16.mxu1 %vm4113_vm3, %v4105_v19 }
 0x7a6   : > { %v1607_v46 = vpop.f32.mrb[36].mxu1 }
 0x7a7   : > { %v1608_v47 = vadd.f32 %v1607_v46, %v4601_v18  ;;  %v3680_v48 = vpop.f32.mrb[37].mxu1 }
 0x7a8   : > { %v1610_v2 = vpop.f32.mrb[38].mxu1  ;;  %v1948_v48 = vpop.permute.xlu1 %1947 }
 0x7a9   : > { %v1613_v50 = vmax.f32 %v1608_v47, 0.0  ;;  %v3681_v51 = vpop.f32.mrb[39].mxu1 }
 0x7ab   : > { %v1617_v52 = vsel %vm1616_vm7, %v1613_v50, 0.0 }
 0x7ac   : > { %v1618_v53 = vadd.f32 %v1617_v52, %v1455_v49 }
 0x7b5   : > { %v1726_v54 = vpop.f32.mrb[40].mxu1 }
 0x7b6   : > { %v1727_v56 = vadd.f32 %v1726_v54, %v4533_v55  ;;  %v3694_v57 = vpop.f32.mrb[41].mxu1 }
 0x7b7   : > { %v1729_v58 = vpop.f32.mrb[42].mxu1 }
 0x7b8   : > { %v1730_v20 = vadd.f32 %v1729_v58, %v4536_v59  ;;  %v3695_v39 = vpop.f32.mrb[43].mxu1  ;;  %v1733_v23 = vmax.f32 %v1727_v56, 0.0 }
 0x7ba   : > { %v1734_v24 = vmax.f32 %v1730_v20, 0.0 }
 0x7bc   : > { %v1735_v25 = vpack.c.bf16 %v1734_v24, %v1733_v23 }
 0x7bd   : > { %v3706_v26 = vpop.f32.mrb[44].mxu1 }
 0x7be   : > { %v1843_v44 = vadd.f32 %v3706_v26, %v4401_v27  ;;  %3697 = vmatpush3.bf16.msra.mxu0 %v1735_v25  ;;  %v1826_v31 = vpop.f32.mrb[45].mxu1 }
 0x7bf   : > { %v1841_v32 = vadd.f32 %v1826_v31, %v4403_v28  ;;  %v3707_v33 = vpop.f32.mrb[46].mxu1  ;;  %3708 = vmatprep.subr.bf16.mxu0 %v4105_v19 }
 0x7c0   : > { %v1847_v49 = vadd.f32 %v1843_v44, %v4491_v62  ;;  %v1844_v36 = vadd.f32 %v3707_v33, %v4405_v29  ;;  %v1829_v38 = vpop.f32.mrb[47].mxu1 }
 0x7c1   : > { %v1845_v40 = vadd.f32 %v1841_v32, %v4489_v61  ;;  %v1842_v13 = vadd.f32 %v1829_v38, %v4407_v30  ;;  %3699 = vmatmul.mubr.msk.bf16.vlgmr.msra.gmra.mrb[44].mxu0 %vm915_vm5, %v4539_v10 }
 0x7c2   : > { %v1848_v60 = vadd.f32 %v1844_v36, %v4495_v0  ;;  %3712 = vmatprep.mubr.msk.bf16.mxu0 %vm4113_vm3, %v4105_v19  ;;  %v1851_v42 = vmax.f32 %v1847_v49, 0.0 }
 0x7c3   : > { %v1846_v41 = vadd.f32 %v1842_v13, %v4493_v63  ;;  %v1849_v45 = vmax.f32 %v1845_v40, 0.0 }
 0x7c4   : > { %v1852_v43 = vmax.f32 %v1848_v60, 0.0 }
 0x7c5   : > { %v1850_v1 = vmax.f32 %v1846_v41, 0.0 }
 0x7c6   : > { %v1854_v46 = vpack.c.bf16 %v1852_v43, %v1851_v42 }
 0x7c7   : > { %v1853_v47 = vpack.c.bf16 %v1850_v1, %v1849_v45 }
 0x7c9   : > { %3709 = vmatpush3.bf16.msra.mxu0 %v1853_v47 }
 0x7ca   : > { %3710 = vmatprep.subr.bf16.mxu0 %v4105_v19 }
 0x7cd   : > { %3711 = vmatpush3.bf16.msra.mxu0 %v1854_v46 }
 0x7ce   : > { %3879 = vmatprep.subr.msk.bf16.mxu0 %vm580_vm0, %v4371_v21 }
 0x7d0   : > { %3713 = vmatmul.mubr.msk.bf16.vlgmr.msra.gmra.mrb[48].mxu0 %vm862_vm4, %v4518_v35 }
 0x7d1   : > { %3724 = vmatprep.mubr.msk.bf16.mxu0 %vm555_vm1, %v4587_v7  ;;  %3723 = vmatpush3.bf16.msra.mxu0 %v4377_v22 }
 0x7d2   : > { %3736 = vmatprep.subr.bf16.mxu0 %v4105_v19 }
 0x7d8   : > { %3725 = vmatmul.mubr.msk.bf16.vlgmr.msra.gmra.mrb[52].mxu0 %vm555_vm1, %v1948_v48 }
 0x7d9   : > { %3738 = vmatprep.mubr.msk.bf16.mxu0 %vm4113_vm3, %v4105_v19 }
 0x894   : > { %v1770_v2 = vpop.f32.mrb[44].mxu0 }
 0x895   : > { %v1771_v50 = vadd.f32 %v1770_v2, %v4601_v18  ;;  %v3700_v51 = vpop.f32.mrb[45].mxu0 }
 0x896   : > { %v1773_v7 = vpop.f32.mrb[46].mxu0 }
 0x897   : > { %v1776_v52 = vmax.f32 %v1771_v50, 0.0  ;;  %v3701_v54 = vpop.f32.mrb[47].mxu0 }
 0x899   : > { %v1780_v56 = vsel %vm1779_vm10, %v1776_v52, 0.0  ;;  %vm3187_vm10 = vcmask 29696  }
 0x89a   : > { %v1781_v57 = vadd.f32 %v1780_v56, %v1618_v53  ;;  %v4760_v56 = vpop.permute.xlu1 %2176 }
 0x8a3   : > { %v1889_v58 = vpop.f32.mrb[48].mxu0 }
 0x8a4   : > { %v1890_v20 = vadd.f32 %v1889_v58, %v4533_v55  ;;  %v3714_v39 = vpop.f32.mrb[49].mxu0 }
 0x8a5   : > { %v1892_v23 = vpop.f32.mrb[50].mxu0 }
 0x8a6   : > { %v1893_v24 = vadd.f32 %v1892_v23, %v4536_v59  ;;  %v3715_v25 = vpop.f32.mrb[51].mxu0  ;;  %v1896_v26 = vmax.f32 %v1890_v20, 0.0 }
 0x8a8   : > { %v1897_v44 = vmax.f32 %v1893_v24, 0.0 }
 0x8aa   : > { %v1898_v31 = vpack.c.bf16 %v1897_v44, %v1896_v26  ;;  %v4767_v26 = vpop.permute.xlu1 %2186 }
 0x8ab   : > { %v3726_v32 = vpop.f32.mrb[52].mxu0 }
 0x8ac   : > { %v2006_v33 = vadd.f32 %v3726_v32, %v4401_v27  ;;  %3717 = vmatpush3.bf16.msra.mxu1 %v1898_v31  ;;  %v1989_v49 = vpop.f32.mrb[53].mxu0 }
 0x8ad   : > { %v2004_v36 = vadd.f32 %v1989_v49, %v4403_v28  ;;  %v3727_v38 = vpop.f32.mrb[54].mxu0  ;;  %3728 = vmatprep.subr.bf16.mxu1 %v4105_v19 }
 0x8ae   : > { %v2010_v53 = vadd.f32 %v2006_v33, %v4491_v62  ;;  %v2007_v40 = vadd.f32 %v3727_v38, %v4405_v29  ;;  %v1992_v13 = vpop.f32.mrb[55].mxu0 }
 0x8af   : > { %v2008_v60 = vadd.f32 %v2004_v36, %v4489_v61  ;;  %v2005_v41 = vadd.f32 %v1992_v13, %v4407_v30  ;;  %3719 = vmatmul.mubr.msk.bf16.vlgmr.msra.gmra.mrb[48].mxu1 %vm915_vm5, %v4539_v10 }
 0x8b0   : > { %v2011_v27 = vadd.f32 %v2007_v40, %v4495_v0  ;;  %3732 = vmatprep.mubr.msk.bf16.mxu1 %vm4113_vm3, %v4105_v19  ;;  %v2014_v42 = vmax.f32 %v2010_v53, 0.0 }
 0x8b1   : > { %v2009_v28 = vadd.f32 %v2005_v41, %v4493_v63  ;;  %v2012_v62 = vmax.f32 %v2008_v60, 0.0  ;;  %v4778_v60 = vld [vmem:[#allocation4 + $0x8] sm:$0xff]  }
 0x8b2   : > { %v2015_v43 = vmax.f32 %v2011_v27, 0.0 }
 0x8b3   : > { %v2013_v45 = vmax.f32 %v2009_v28, 0.0 }
 0x8b4   : > { %v2017_v29 = vpack.c.bf16 %v2015_v43, %v2014_v42 }
 0x8b5   : > { %v2016_v1 = vpack.c.bf16 %v2013_v45, %v2012_v62 }
 0x8b7   : > { %3729 = vmatpush3.bf16.msra.mxu1 %v2016_v1 }
 0x8b8   : > { %3730 = vmatprep.subr.bf16.mxu1 %v4105_v19 }
 0x8bb   : > { %3731 = vmatpush3.bf16.msra.mxu1 %v2017_v29 }
 0x8bc   : > { %3880 = vmatprep.subr.msk.bf16.mxu1 %vm580_vm0, %v4371_v21 }
 0x8be   : > { %3733 = vmatmul.mubr.msk.bf16.vlgmr.msra.gmra.mrb[52].mxu1 %vm862_vm4, %v4518_v35 }
 0x8bf   : > { %3744 = vmatprep.mubr.msk.bf16.mxu1 %vm555_vm1, %v4411_v37  ;;  %3743 = vmatpush3.bf16.msra.mxu1 %v4377_v22 }
 0x8c0   : > { %3756 = vmatprep.subr.bf16.mxu1 %v4105_v19 }
 0x8c6   : > { %3745 = vmatmul.mubr.msk.bf16.vlgmr.msra.gmra.mrb[56].mxu1 %vm555_vm1, %v4409_v34 }
 0x8c7   : > { %3758 = vmatprep.mubr.msk.bf16.mxu1 %vm4113_vm3, %v4105_v19 }
 0x982   : > { %v1933_v30 = vpop.f32.mrb[48].mxu1 }
 0x983   : > { %v1934_v61 = vadd.f32 %v1933_v30, %v4601_v18  ;;  %v3720_v63 = vpop.f32.mrb[49].mxu1 }
 0x984   : > { %v1936_v37 = vpop.f32.mrb[50].mxu1 }
 0x985   : > { %v1939_v0 = vmax.f32 %v1934_v61, 0.0  ;;  %v3721_v35 = vpop.f32.mrb[51].mxu1 }
 0x987   : > { %v1943_v46 = vsel %vm1942_vm13, %v1939_v0, 0.0 }
 0x988   : > { %v1944_v47 = vadd.f32 %v1943_v46, %v1781_v57 }
 0x991   : > { %v2052_v48 = vpop.f32.mrb[52].mxu1 }
 0x992   : > { %v2053_v34 = vadd.f32 %v2052_v48, %v4533_v55  ;;  %v3734_v2 = vpop.f32.mrb[53].mxu1 }
 0x993   : > { %v2055_v50 = vpop.f32.mrb[54].mxu1 }
 0x994   : > { %v2056_v51 = vadd.f32 %v2055_v50, %v4536_v59  ;;  %v3735_v7 = vpop.f32.mrb[55].mxu1  ;;  %v2059_v52 = vmax.f32 %v2053_v34, 0.0 }
 0x996   : > { %v2060_v54 = vmax.f32 %v2056_v51, 0.0 }
 0x998   : > { %v2061_v58 = vpack.c.bf16 %v2060_v54, %v2059_v52 }
 0x999   : > { %v3746_v20 = vpop.f32.mrb[56].mxu1 }
 0x99a   : > { %v2167_v39 = vadd.f32 %v3746_v20, %v4501_v3  ;;  %3737 = vmatpush3.bf16.msra.mxu0 %v2061_v58  ;;  %v2150_v23 = vpop.f32.mrb[57].mxu1 }
 0x99b   : > { %v2165_v57 = vadd.f32 %v2150_v23, %v4503_v4  ;;  %v3747_v24 = vpop.f32.mrb[58].mxu1  ;;  %3748 = vmatprep.subr.bf16.mxu0 %v4105_v19 }
 0x99c   : > { %v2191_v55 = vadd.f32 %v4591_v9, %v2167_v39  ;;  %v2168_v59 = vadd.f32 %v3747_v24, %v4505_v5  ;;  %v2153_v25 = vpop.f32.mrb[59].mxu1 }
 0x99d   : > { %v2189_v44 = vadd.f32 %v4589_v8, %v2165_v57  ;;  %v2166_v31 = vadd.f32 %v2153_v25, %v4507_v6  ;;  %3739 = vmatmul.mubr.msk.bf16.vlgmr.msra.gmra.mrb[56].mxu0 %vm915_vm5, %v4539_v10  ;;  %v2316_v10 = vpop.permute.xlu1 %2315 }
 0x99e   : > { %v2192_v32 = vadd.f32 %v4767_v26, %v2168_v59  ;;  %3752 = vmatprep.mubr.msk.bf16.mxu0 %vm4113_vm3, %v4105_v19  ;;  %v2195_v49 = vmax.f32 %v2191_v55, 0.0 }
 0x99f   : > { %v2190_v33 = vadd.f32 %v4760_v56, %v2166_v31  ;;  %v2193_v38 = vmax.f32 %v2189_v44, 0.0 }
 0x9a0   : > { %v2196_v36 = vmax.f32 %v2192_v32, 0.0 }
 0x9a1   : > { %v2194_v53 = vmax.f32 %v2190_v33, 0.0  ;;  %v4797_v61 = vpop.permute.xlu1 %2206 }
 0x9a2   : > { %v2198_v40 = vpack.c.bf16 %v2196_v36, %v2195_v49 }
 0x9a3   : > { %v2197_v13 = vpack.c.bf16 %v2194_v53, %v2193_v38 }
 0x9a5   : > { %3749 = vmatpush3.bf16.msra.mxu0 %v2197_v13  ;;  %v2475_v31 = vpop.permute.xlu1 %2474 }
 0x9a6   : > { %3750 = vmatprep.subr.bf16.mxu0 %v4105_v19 }
 0x9a9   : > { %3751 = vmatpush3.bf16.msra.mxu0 %v2198_v40 }
 0x9aa   : > { %3881 = vmatprep.subr.msk.bf16.mxu0 %vm580_vm0, %v4371_v21 }
 0x9ac   : > { %3753 = vmatmul.mubr.msk.bf16.vlgmr.msra.gmra.mrb[60].mxu0 %vm862_vm4, %v4778_v60 }
 0x9ad   : > { %3764 = vmatprep.mubr.msk.bf16.mxu0 %vm555_vm1, %v4593_v11  ;;  %3763 = vmatpush3.bf16.msra.mxu0 %v4377_v22 }
 0x9ae   : > { %3776 = vmatprep.subr.bf16.mxu0 %v4105_v19 }
 0x9b4   : > { %3765 = vmatmul.mubr.msk.bf16.vlgmr.msra.gmra.mrb[64].mxu0 %vm555_vm1, %v2316_v10 }
 0x9b5   : > { %3778 = vmatprep.mubr.msk.bf16.mxu0 %vm4113_vm3, %v4105_v19 }
 0xa70   : > { %v2096_v41 = vpop.f32.mrb[56].mxu0 }
 0xa71   : > { %v2097_v27 = vadd.f32 %v2096_v41, %v4601_v18  ;;  %v3740_v28 = vpop.f32.mrb[57].mxu0 }
 0xa72   : > { %v2099_v11 = vpop.f32.mrb[58].mxu0 }
 0xa73   : > { %v2102_v42 = vmax.f32 %v2097_v27, 0.0  ;;  %v3741_v43 = vpop.f32.mrb[59].mxu0 }
 0xa75   : > { %v2106_v62 = vsel %vm2105_vm2, %v2102_v42, 0.0 }
 0xa76   : > { %v4794_v45 = vadd.f32 %v2106_v62, %v1944_v47  ;;  %v4801_v47 = vld [vmem:[#allocation6 + $0x4] sm:$0x7] }
 0xa7f   : > { %v2251_v29 = vpop.f32.mrb[60].mxu0 }
 0xa80   : > { %v2252_v1 = vadd.f32 %v2251_v29, %v4595_v12  ;;  %v3754_v30 = vpop.f32.mrb[61].mxu0 }
 0xa81   : > { %v2254_v63 = vpop.f32.mrb[62].mxu0 }
 0xa82   : > { %v2255_v37 = vadd.f32 %v2254_v63, %v4797_v61  ;;  %v3755_v0 = vpop.f32.mrb[63].mxu0  ;;  %v2258_v35 = vmax.f32 %v2252_v1, 0.0 }
 0xa84   : > { %v2259_v18 = vmax.f32 %v2255_v37, 0.0 }
 0xa86   : > { %v2260_v46 = vpack.c.bf16 %v2259_v18, %v2258_v35 }
 0xa87   : > { %v3766_v48 = vpop.f32.mrb[64].mxu0 }
 0xa88   : > { %v2374_v34 = vadd.f32 %v3766_v48, %v4501_v3  ;;  %3757 = vmatpush3.bf16.msra.mxu1 %v2260_v46  ;;  %v2357_v2 = vpop.f32.mrb[65].mxu0 }
 0xa89   : > { %v2372_v50 = vadd.f32 %v2357_v2, %v4503_v4  ;;  %v3767_v51 = vpop.f32.mrb[66].mxu0  ;;  %3768 = vmatprep.subr.bf16.mxu1 %v4105_v19 }
 0xa8a   : > { %v2378_v7 = vadd.f32 %v2374_v34, %v4591_v9  ;;  %v2375_v52 = vadd.f32 %v3767_v51, %v4505_v5  ;;  %v2360_v54 = vpop.f32.mrb[67].mxu0 }
 0xa8b   : > { %v2376_v58 = vadd.f32 %v2372_v50, %v4589_v8  ;;  %v2373_v20 = vadd.f32 %v2360_v54, %v4507_v6  ;;  %3759 = vmatmul.mubr.msk.bf16.vlgmr.msra.gmra.mrb[60].mxu1 %vm915_vm5, %v4801_v47 }
 0xa8c   : > { %v2379_v39 = vadd.f32 %v2375_v52, %v4767_v26  ;;  %3772 = vmatprep.mubr.msk.bf16.mxu1 %vm4113_vm3, %v4105_v19  ;;  %v2382_v57 = vmax.f32 %v2378_v7, 0.0  ;;  %v2634_v7 = vpop.permute.xlu1 %2633 }
 0xa8d   : > { %v2377_v23 = vadd.f32 %v2373_v20, %v4760_v56  ;;  %v2380_v55 = vmax.f32 %v2376_v58, 0.0 }
 0xa8e   : > { %v2383_v24 = vmax.f32 %v2379_v39, 0.0 }
 0xa8f   : > { %v2381_v59 = vmax.f32 %v2377_v23, 0.0 }
 0xa90   : > { %v2385_v25 = vpack.c.bf16 %v2383_v24, %v2382_v57  ;;  %v4854_v52 = vpop.permute.xlu1 %2263 }
 0xa91   : > { %v2384_v44 = vpack.c.bf16 %v2381_v59, %v2380_v55 }
 0xa93   : > { %3769 = vmatpush3.bf16.msra.mxu1 %v2384_v44 }
 0xa94   : > { %3770 = vmatprep.subr.bf16.mxu1 %v4105_v19 }
 0xa97   : > { %3771 = vmatpush3.bf16.msra.mxu1 %v2385_v25 }
 0xa98   : > { %3882 = vmatprep.subr.msk.bf16.mxu1 %vm580_vm0, %v4371_v21 }
 0xa9a   : > { %3773 = vmatmul.mubr.msk.bf16.vlgmr.msra.gmra.mrb[64].mxu1 %vm862_vm4, %v4778_v60 }
 0xa9b   : > { %3784 = vmatprep.mubr.msk.bf16.mxu1 %vm555_vm1, %v4597_v14  ;;  %3783 = vmatpush3.bf16.msra.mxu1 %v4377_v22 }
 0xa9c   : > { %3796 = vmatprep.subr.bf16.mxu1 %v4105_v19 }
 0xaa2   : > { %3785 = vmatmul.mubr.msk.bf16.vlgmr.msra.gmra.mrb[68].mxu1 %vm555_vm1, %v2475_v31 }
 0xaa3   : > { %3798 = vmatprep.mubr.msk.bf16.mxu1 %vm4113_vm3, %v4105_v19 }
 0xb5e   : > { %v2303_v32 = vpop.f32.mrb[60].mxu1 }
 0xb5f   : > { %v3760_v33 = vpop.f32.mrb[61].mxu1 }
 0xb60   : > { %v2306_v49 = vpop.f32.mrb[62].mxu1 }
 0xb61   : > { %v3761_v36 = vpop.f32.mrb[63].mxu1 }
 0xb6d   : > { %v2420_v38 = vpop.f32.mrb[64].mxu1 }
 0xb6e   : > { %v2421_v53 = vadd.f32 %v2420_v38, %v4595_v12  ;;  %v3774_v40 = vpop.f32.mrb[65].mxu1 }
 0xb6f   : > { %v2423_v13 = vpop.f32.mrb[66].mxu1 }
 0xb70   : > { %v2424_v14 = vadd.f32 %v2423_v13, %v4797_v61  ;;  %v3775_v10 = vpop.f32.mrb[67].mxu1  ;;  %v2427_v41 = vmax.f32 %v2421_v53, 0.0 }
 0xb72   : > { %v2428_v27 = vmax.f32 %v2424_v14, 0.0 }
 0xb74   : > { %v2429_v28 = vpack.c.bf16 %v2428_v27, %v2427_v41 }
 0xb75   : > { %v3786_v11 = vpop.f32.mrb[68].mxu1 }
 0xb76   : > { %v2533_v42 = vadd.f32 %v3786_v11, %v4501_v3  ;;  %3777 = vmatpush3.bf16.msra.mxu0 %v2429_v28  ;;  %v2516_v43 = vpop.f32.mrb[69].mxu1 }
 0xb77   : > { %v2531_v62 = vadd.f32 %v2516_v43, %v4503_v4  ;;  %v3787_v29 = vpop.f32.mrb[70].mxu1  ;;  %3788 = vmatprep.subr.bf16.mxu0 %v4105_v19 }
 0xb78   : > { %v2537_v1 = vadd.f32 %v2533_v42, %v4591_v9  ;;  %v2534_v30 = vadd.f32 %v3787_v29, %v4505_v5  ;;  %v2519_v63 = vpop.f32.mrb[71].mxu1 }
 0xb79   : > { %v2535_v37 = vadd.f32 %v2531_v62, %v4589_v8  ;;  %v2532_v0 = vadd.f32 %v2519_v63, %v4507_v6  ;;  %3779 = vmatmul.mubr.msk.bf16.vlgmr.msra.gmra.mrb[68].mxu0 %vm915_vm5, %v4801_v47 }
 0xb7a   : > { %v2538_v35 = vadd.f32 %v2534_v30, %v4767_v26  ;;  %3792 = vmatprep.mubr.msk.bf16.mxu0 %vm4113_vm3, %v4105_v19  ;;  %v2541_v46 = vmax.f32 %v2537_v1, 0.0 }
 0xb7b   : > { %v2536_v18 = vadd.f32 %v2532_v0, %v4760_v56  ;;  %v2539_v34 = vmax.f32 %v2535_v37, 0.0 }
 0xb7c   : > { %v2542_v48 = vmax.f32 %v2538_v35, 0.0 }
 0xb7d   : > { %v2540_v2 = vmax.f32 %v2536_v18, 0.0  ;;  %v4114_v18 = vmov 65535  }
 0xb7e   : > { %v2544_v50 = vpack.c.bf16 %v2542_v48, %v2541_v46 }
 0xb7f   : > { %v2543_v51 = vpack.c.bf16 %v2540_v2, %v2539_v34  ;;  %v2798_v34 = vpack.c.bf16 %v4794_v45, %v4794_v45  ;;  %v3962_v45 = vld [vmem:[%s4945_s6 + $0x8] sm:$0xff]  }
 0xb81   : > { %3789 = vmatpush3.bf16.msra.mxu0 %v2543_v51 }
 0xb82   : > { %3790 = vmatprep.subr.bf16.mxu0 %v4105_v19 }
 0xb85   : > { %3791 = vmatpush3.bf16.msra.mxu0 %v2544_v50 }
 0xb86   : > { %3883 = vmatprep.subr.msk.bf16.mxu0 %vm580_vm0, %v4371_v21  ;;  %v2304_v21 = vadd.f32 %v2303_v32, %v4854_v52 }
 0xb88   : > { %3793 = vmatmul.mubr.msk.bf16.vlgmr.msra.gmra.mrb[72].mxu0 %vm862_vm4, %v4778_v60 }
 0xb89   : > { %3804 = vmatprep.mubr.msk.bf16.mxu0 %vm555_vm1, %v4599_v15  ;;  %3803 = vmatpush3.bf16.msra.mxu0 %v4377_v22  ;;  %v2309_v15 = vmax.f32 %v2304_v21, 0.0 }
 0xb8a   : > { %3816 = vmatprep.subr.bf16.mxu0 %v4105_v19 }
 0xb90   : > { %3805 = vmatmul.mubr.msk.bf16.vlgmr.msra.gmra.mrb[76].mxu0 %vm555_vm1, %v2634_v7  ;;  %vm2816_vm1 = vcmask 1042432  }
 0xb91   : > { %3818 = vmatprep.mubr.msk.bf16.mxu0 %vm4113_vm3, %v4105_v19 }
 0xc4c   : > { %v2464_v54 = vpop.f32.mrb[68].mxu0 }
 0xc4d   : > { %v2465_v58 = vadd.f32 %v2464_v54, %v4854_v52  ;;  %v3780_v20 = vpop.f32.mrb[69].mxu0 }
 0xc4e   : > { %v2467_v39 = vpop.f32.mrb[70].mxu0 }
 0xc4f   : > { %v2470_v23 = vmax.f32 %v2465_v58, 0.0  ;;  %v3781_v22 = vpop.f32.mrb[71].mxu0 }
 0xc51   : > { %v2471_v57 = vadd.f32 %v2470_v23, %v2309_v15 }
 0xc5b   : > { %v2579_v24 = vpop.f32.mrb[72].mxu0 }
 0xc5c   : > { %v2580_v55 = vadd.f32 %v2579_v24, %v4595_v12  ;;  %v3794_v59 = vpop.f32.mrb[73].mxu0  ;;  %v3964_v24 = vld [vmem:[%s4945_s6 + $0x18] sm:$0xff]  }
 0xc5d   : > { %v2582_v25 = vpop.f32.mrb[74].mxu0 }
 0xc5e   : > { %v2583_v44 = vadd.f32 %v2582_v25, %v4797_v61  ;;  %v3795_v31 = vpop.f32.mrb[75].mxu0  ;;  %v2586_v33 = vmax.f32 %v2580_v55, 0.0  ;;  %v2956_v55 = vpop.permute.xlu1 %2955 }
 0xc60   : > { %v2587_v49 = vmax.f32 %v2583_v44, 0.0 }
 0xc62   : > { %v2588_v32 = vpack.c.bf16 %v2587_v49, %v2586_v33  ;;  %v2966_v33 = vpop.permute.xlu1 %2965 }
 0xc63   : > { %v3806_v36 = vpop.f32.mrb[76].mxu0 }
 0xc64   : > { %v2692_v38 = vadd.f32 %v3806_v36, %v4501_v3  ;;  %3797 = vmatpush3.bf16.msra.mxu1 %v2588_v32  ;;  %v2675_v53 = vpop.f32.mrb[77].mxu0 }
 0xc65   : > { %v2690_v40 = vadd.f32 %v2675_v53, %v4503_v4  ;;  %v3807_v13 = vpop.f32.mrb[78].mxu0  ;;  %3808 = vmatprep.subr.bf16.mxu1 %v4105_v19 }
 0xc66   : > { %v2696_v14 = vadd.f32 %v2692_v38, %v4591_v9  ;;  %v2693_v10 = vadd.f32 %v3807_v13, %v4505_v5  ;;  %v2678_v41 = vpop.f32.mrb[79].mxu0 }
 0xc67   : > { %v2694_v27 = vadd.f32 %v2690_v40, %v4589_v8  ;;  %v2691_v28 = vadd.f32 %v2678_v41, %v4507_v6  ;;  %3799 = vmatmul.mubr.msk.bf16.vlgmr.msra.gmra.mrb[72].mxu1 %vm915_vm5, %v4801_v47 }
 0xc68   : > { %v2697_v3 = vadd.f32 %v2693_v10, %v4767_v26  ;;  %3812 = vmatprep.mubr.msk.bf16.mxu1 %vm4113_vm3, %v4105_v19  ;;  %v2700_v11 = vmax.f32 %v2696_v14, 0.0 }
 0xc69   : > { %v2695_v4 = vadd.f32 %v2691_v28, %v4760_v56  ;;  %v2698_v9 = vmax.f32 %v2694_v27, 0.0  ;;  %v3965_v28 = vld [vmem:[#allocation4 + $0x10] sm:$0xff]  }
 0xc6a   : > { %v2701_v42 = vmax.f32 %v2697_v3, 0.0 }
 0xc6b   : > { %v2699_v43 = vmax.f32 %v2695_v4, 0.0 }
 0xc6c   : > { %v2703_v5 = vpack.c.bf16 %v2701_v42, %v2700_v11 }
 0xc6d   : > { %v2702_v62 = vpack.c.bf16 %v2699_v43, %v2698_v9  ;;  %v2986_v9 = vpop.permute.xlu1 %2985 }
 0xc6f   : > { %3809 = vmatpush3.bf16.msra.mxu1 %v2702_v62 }
 0xc70   : > { %3810 = vmatprep.subr.bf16.mxu1 %v4105_v19 }
 0xc73   : > { %3811 = vmatpush3.bf16.msra.mxu1 %v2703_v5 }
 0xc74   : > { %3834 = vmatprep.subr.bf16.mxu1 %v4105_v19 }
 0xc76   : > { %3813 = vmatmul.mubr.msk.bf16.vlgmr.msra.gmra.mrb[76].mxu1 %vm862_vm4, %v4778_v60  ;;  %v2817_v60 = vsel %vm580_vm0, 4294967295, %v4114_v18  ;;  %vm2809_vm0 = vcmask 39936  }
 0xc77   : > { %3838 = vmatprep.mubr.msk.bf16.mxu1 %vm4113_vm3, %v4105_v19  ;;  %v2818_v51 = vsel %vm2816_vm1, %v2817_v60, 0 }
 0xc78   : > { %v2820_v21 = vand.u32 %v2818_v51, %v2798_v34 }
 0xd3a   : > { %v2623_v6 = vpop.f32.mrb[72].mxu1 }
 0xd3b   : > { %v2624_v8 = vadd.f32 %v2623_v6, %v4854_v52  ;;  %v3800_v56 = vpop.f32.mrb[73].mxu1 }
 0xd3c   : > { %v2626_v26 = vpop.f32.mrb[74].mxu1 }
 0xd3d   : > { %v2629_v29 = vmax.f32 %v2624_v8, 0.0  ;;  %v3801_v1 = vpop.f32.mrb[75].mxu1  ;;  %v498_v26 = vld [vmem:[#allocation6 + $0x8] sm:$0x7] }
 0xd3e   : > { %v454_v1 = vand.u32 3, %v4366_v17 }
 0xd3f   : > { %v2630_v30 = vadd.f32 %v2629_v29, %v2471_v57  ;;  %v451_v29 = vadd.s32 8, %v4366_v17 }
 0xd40   : > { %vm458_vm6 = vcmp.eq.s32.totalorder %v454_v1, %v4364_v16 }
 0xd49   : > { %v2738_v63 = vpop.f32.mrb[76].mxu1 }
 0xd4a   : > { %v2739_v37 = vadd.f32 %v2738_v63, %v4595_v12  ;;  %v3814_v0 = vpop.f32.mrb[77].mxu1  ;;  %v3961_v12 = vld [vmem:[%s4945_s6] sm:$0xff]   ;;  %v452_v63 = vadd.s32 16, %v4366_v17 }
 0xd4b   : > { %v2741_v35 = vpop.f32.mrb[78].mxu1  ;;  %v4115_v0 = vmov 1.0|1.0  }
 0xd4c   : > { %v2742_v46 = vadd.f32 %v2741_v35, %v4797_v61  ;;  %v3815_v48 = vpop.f32.mrb[79].mxu1  ;;  %v2745_v2 = vmax.f32 %v2739_v37, 0.0  ;;  %v3963_v61 = vld [vmem:[%s4945_s6 + $0x10] sm:$0xff]   ;;  %v453_v37 = vadd.s32 24, %v4366_v17  ;;  %v456_v35 = vand.u32 3, %v452_v63 }
 0xd4e   : > { %v2746_v50 = vmax.f32 %v2742_v46, 0.0  ;;  %v457_v18 = vand.u32 3, %v453_v37 }
 0xd50   : > { %v2747_v7 = vpack.c.bf16 %v2746_v50, %v2745_v2 }
 0xd52   : > { %3817 = vmatpush3.bf16.msra.mxu0 %v2747_v7 }
 0xd53   : > { %3822 = vmatprep.subr.bf16.mxu0 %v2820_v21 }
 0xd55   : > { %3819 = vmatmul.mubr.msk.bf16.vlgmr.msra.gmra.mrb[80].mxu0 %vm915_vm5, %v4801_v47 }
 0xd56   : > { %3823 = vmatpush3.bf16.msra.mxu0 %v2820_v21  ;;  %3824 = vmatprep.mubr.msk.bf16.mxu0 %vm2809_vm0, %v3961_v12 }
 0xd5d   : > { %3825 = vmatmul.mubr.msk.bf16.vlgmr.msra.gmra.mrb[12].mxu0 %vm2809_vm0, %v3962_v45 }
 0xd5e   : > { %3830 = vmatprep.mubr.msk.bf16.mxu0 %vm2809_vm0, %v3963_v61  ;;  %v3133_v61 = vld [vmem:[#allocation7] sm:$0x3] }
 0xe28   : > { %v2782_v47 = vpop.f32.mrb[80].mxu0 }
 0xe29   : > { %v2783_v54 = vadd.f32 %v2782_v47, %v4854_v52  ;;  %v3820_v58 = vpop.f32.mrb[81].mxu0  ;;  %v2951_v52 = vpop.permute.xlu0 %2950 }
 0xe2a   : > { %v2785_v20 = vpop.f32.mrb[82].mxu0  ;;  %v3138_v47 = vpop.permute.xlu1 %3137 }
 0xe2b   : > { %v2788_v39 = vmax.f32 %v2783_v54, 0.0  ;;  %v3821_v15 = vpop.f32.mrb[83].mxu0 }
 0xe2d   : > { %v2789_v23 = vadd.f32 %v2788_v39, %v2630_v30  ;;  %v2961_v59 = vpop.permute.xlu0 %2960  ;;  %v455_v30 = vand.u32 3, %v451_v29 }
 0xe2f   : > { %v2875_v22 = vpack.c.bf16 %v2789_v23, %v2789_v23  ;;  %vm459_vm7 = vcmp.eq.s32.totalorder %v455_v30, %v4364_v16 }
 0xe30   : > { %vm3426_vm8 = vmpackc.low %vm459_vm7, %vm458_vm6 }
 0xe31   : > { %v2893_v57 = vand.u32 %v2875_v22, %v2818_v51  ;;  %v2981_v3 = vpop.permute.xlu0 %2980 }
 0xe33   : > { %3828 = vmatprep.subr.bf16.mxu0 %v2893_v57 }
 0xe34   : > { %3829 = vmatpush3.bf16.msra.mxu0 %v2893_v57 }
 0xe35   : > { %3856 = vmatprep.subr.bf16.mxu0 %v4105_v19  ;;  %v3043_v60 = vpop.permute.xlu0 %3042 }
 0xe37   : > { %3831 = vmatmul.mubr.msk.bf16.vlgmr.msra.gmra.mrb[12].mxu0 %vm2809_vm0, %v3964_v24 }
 0xe38   : > { %3858 = vmatprep.mubr.msk.bf16.mxu0 %vm4113_vm3, %v4105_v19 }
 0xf0a   : > { %v3832_v25 = vpop.f32.mrb[12].mxu0 }
 0xf0b   : > { %v2970_v44 = vadd.f32 %v3832_v25, %v2961_v59  ;;  %v2929_v31 = vpop.f32.mrb[13].mxu0 }
 0xf0c   : > { %v2968_v49 = vadd.f32 %v2951_v52, %v2929_v31  ;;  %v3833_v32 = vpop.f32.mrb[14].mxu0 }
 0xf0d   : > { %v2971_v36 = vadd.f32 %v3833_v32, %v2966_v33  ;;  %v2932_v38 = vpop.f32.mrb[15].mxu0  ;;  %v2974_v40 = vmax.f32 %v2970_v44, 0.0 }
 0xf0e   : > { %v2969_v53 = vadd.f32 %v2956_v55, %v2932_v38  ;;  %v2972_v14 = vmax.f32 %v2968_v49, 0.0 }
 0xf0f   : > { %v2975_v13 = vmax.f32 %v2971_v36, 0.0 }
 0xf10   : > { %v2973_v10 = vmax.f32 %v2969_v53, 0.0 }
 0xf11   : > { %v2977_v41 = vpack.c.bf16 %v2975_v13, %v2974_v40 }
 0xf12   : > { %v2976_v27 = vpack.c.bf16 %v2973_v10, %v2972_v14 }
 0xf14   : > { %3835 = vmatpush3.bf16.msra.mxu1 %v2976_v27 }
 0xf15   : > { %3836 = vmatprep.subr.bf16.mxu1 %v4105_v19 }
 0xf18   : > { %3837 = vmatpush3.bf16.msra.mxu1 %v2977_v41 }
 0xf19   : > { %3842 = vmatprep.subr.bf16.mxu1 %v4105_v19 }
 0xf1b   : > { %3839 = vmatmul.mubr.msk.bf16.vlgmr.msra.gmra.mrb[80].mxu1 %vm862_vm4, %v3965_v28 }
 0xf1c   : > { %3844 = vmatprep.mubr.msk.bf16.mxu1 %vm4113_vm3, %v4105_v19 }
 0xfee   : > { %v3030_v4 = vpop.f32.mrb[80].mxu1 }
 0xfef   : > { %v3031_v11 = vadd.f32 %v3030_v4, %v2981_v3  ;;  %v3840_v42 = vpop.f32.mrb[81].mxu1 }
 0xff0   : > { %v3033_v43 = vpop.f32.mrb[82].mxu1 }
 0xff1   : > { %v3034_v5 = vadd.f32 %v3033_v43, %v2986_v9  ;;  %v3841_v62 = vpop.f32.mrb[83].mxu1  ;;  %v3037_v6 = vmax.f32 %v3031_v11, 0.0 }
 0xff3   : > { %v3038_v8 = vmax.f32 %v3034_v5, 0.0 }
 0xff5   : > { %v3039_v56 = vpack.c.bf16 %v3038_v8, %v3037_v6 }
 0xff7   : > { %3843 = vmatpush3.bf16.msra.mxu1 %v3039_v56 }
 0xff8   : > { %3848 = vmatprep.subr.bf16.mxu1 %v4105_v19 }
 0xffa   : > { %3845 = vmatmul.mubr.msk.bf16.vlgmr.msra.gmra.mrb[84].mxu1 %vm915_vm5, %v498_v26  ;;  %vm461_vm5 = vcmp.eq.s32.totalorder %v457_v18, %v4364_v16 }
 0xffb   : > { %3852 = vmatprep.mubr.msk.bf16.mxu1 %vm4113_vm3, %v4105_v19  ;;  %3849 = vmatpush3.bf16.msk.msra.mxu1 %vm3426_vm8, %v4115_v0  ;;  %vm460_vm3 = vcmp.eq.s32.totalorder %v456_v35, %v4364_v16 }
 0xffc   : > { %3850 = vmatprep.subr.bf16.mxu1 %v4105_v19  ;;  %vm3428_vm9 = vmpackc.low %vm461_vm5, %vm460_vm3 }
 0xfff   : > { %3851 = vmatpush3.bf16.msk.msra.mxu1 %vm3428_vm9, %v4115_v0 }
0x10cd   : > { %v3082_v46 = vpop.f32.mrb[84].mxu1 }
0x10ce   : > { %v3083_v48 = vadd.f32 %v3082_v46, %v3043_v60  ;;  %v3846_v34 = vpop.f32.mrb[85].mxu1 }
0x10cf   : > { %v3085_v2 = vpop.f32.mrb[86].mxu1 }
0x10d0   : > { %v3088_v17 = vmax.f32 %v3083_v48, 0.0  ;;  %v3847_v50 = vpop.f32.mrb[87].mxu1 }
0x10d2   : > { %v3089_v51 = vpack.c.bf16 %v3088_v17, %v3088_v17 }
0x10d4   : > { %3853 = vmatmul.mubr.msk.bf16.vlgmr.msra.gmra.mrb[88].mxu1 %vm862_vm4, %v3089_v51  ;;  %vm3189_vm4 = vcmask 26624  }
0x11a7   : > { %v3127_v16 = vpop.f32.mrb[88].mxu1 }
0x11a8   : > { %v3134_v19 = vpack.c.bf16 %v3127_v16, %v3127_v16  ;;  %3188 = vst.msk [vmem:[%s439_s12] sm:$0x3f] %vm3187_vm10, %v3127_v16  ;;  %v3854_v7 = vpop.f32.mrb[89].mxu1 }
0x11a9   : > { %v3130_v21 = vpop.f32.mrb[90].mxu1 }
0x11aa   : > { %v3855_v12 = vpop.f32.mrb[91].mxu1  ;;  %v3145_v45 = vsel %vm2816_vm1, %v3134_v19, 0 }
0x11ab   : > { %3857 = vmatpush3.bf16.msra.mxu0 %v3145_v45 }
0x11ae   : > { %3859 = vmatmul.mubr.msk.bf16.vlgmr.msra.gmra.mrb[84].mxu0 %vm3140_vm11, %v3133_v61 }
0x1281   : > { %v3181_v54 = vpop.f32.mrb[84].mxu0 }
0x1282   : > { %v3182_v58 = vadd.f32 %v3181_v54, %v3138_v47  ;;  %v3860_v20 = vpop.f32.mrb[85].mxu0 }
0x1283   : > { %v3184_v39 = vpop.f32.mrb[86].mxu0 }
0x1284   : > { %3190 = vst.msk [vmem:[%s435_s24] sm:$0x7] %vm3189_vm4, %v3182_v58  ;;  %v3861_v15 = vpop.f32.mrb[87].mxu0 }
0x1285 PF: > { %s24_s13 = sadd.s32 1, %s4096_s13  }
0x1286   : > { %p21_p6 = scmp.ge.s32.totalorder %s24_s13, 4  }
0x1288   :  { %23 = sbr.rel (!%p21_p6) target bundleno = 3 (0x3), region = 118 }
0x128f   :  { %3224 = vsyncpa [#allocation3], 1 }
0x1290   :  { %3226 = vsyncpa [#allocation3 + $0x1], 1 }
0x1291   :  { %3227 = vsyncpa [#allocation5], 1 }
0x1292   :  { %3228 = vsyncpa [#allocation8], 1 }

</bundles_post_ra>
